<compile_context>
chip_gen: v7x
topology: tpu7x:2x2x1
jax: 0.10.0
libtpu: 0.0.40
codegen_flags: <defaults>
</compile_context>

<pallas_src>
import numpy as np
import jax
import jax.numpy as jnp
from jax import lax
from jax.experimental import pallas as pl
from jax.experimental.pallas import tpu as pltpu

DIM = 64
GROUPS = 8
EPS = 1e-5


# --------------------------------- kernel ------------------------------------ #
def _make_kernel(bblk, L):
    M = bblk * L

    def kernel(x_ref, mnf_ref, mnl_ref, p64_ref, p128_ref,
               w1_ref, b1_ref, g1_ref, be1_ref,
               w2_ref, b2_ref, g2_ref, be2_ref,
               wu_ref, btp_ref, g3_ref, be3_ref,
               w4_ref, b4p_ref,
               out_ref):
        mnf = mnf_ref[...]        # (M, 1) keep-mask: 0.0 on the first row of each sample
        mnl = mnl_ref[...]        # (M, 1) keep-mask: 0.0 on the last  row of each sample
        p64 = p64_ref[...]        # (C, C)   group-mean projection (sum/count + broadcast)
        p128 = p128_ref[...]      # (2C, 2C) group-mean projection, [even|odd] packed

        def dotb(a, w):           # big conv dots: single-pass bf16 MXU, f32 accumulate
            return jnp.dot(a.astype(jnp.bfloat16), w,
                           preferred_element_type=jnp.float32)

        def dot_hi(a, b):         # tiny (Bblk, C) group-projection dots: exact f32
            return jnp.dot(a, b, preferred_element_type=jnp.float32,
                           precision=lax.Precision.HIGHEST)

        def shift_down(x):        # y[r] = x[r-1] within a sample, 0 at sample start
            return pltpu.roll(x, shift=1, axis=0) * mnf

        def shift_up(x):          # y[r] = x[r+1] within a sample, 0 at sample end
            return pltpu.roll(x, shift=M - 1, axis=0) * mnl

        def mish(x):
            # x * tanh(softplus(x)) == x * (1 - 2/(u^2 + 2u + 2)),  u = e^x
            u = jnp.exp(jnp.minimum(x, 30.0))
            return x * (1.0 - 2.0 * pl.reciprocal(u * (u + 2.0) + 2.0, approx=True))

        def gn_mish(h, pmat, gamma, beta):
            # Per-sample GroupNorm; stats via sublane reductions on a 3-D view,
            # group mix via one tiny matmul, broadcast-back via sublane broadcast.
            Cx = h.shape[-1]
            hr = h.reshape(bblk, L, Cx)               # sublane-aligned split (L % 8 == 0)
            s = jnp.sum(hr, axis=1)                   # (Bblk, Cx) exact f32 sums
            s2 = jnp.sum(hr * hr, axis=1)
            mean_c = dot_hi(s, pmat)                  # per-channel group mean
            var_c = jnp.maximum(dot_hi(s2, pmat) - mean_c * mean_c, 0.0)
            scale = lax.rsqrt(var_c + EPS) * gamma
            shift = beta - mean_c * scale
            y = hr * scale[:, None, :] + shift[:, None, :]   # broadcast over L (sublanes)
            return mish(y.reshape(M, Cx))

        # conv1: Conv1d(k=3, pad=1) as 3 per-tap dots (K = Cin, tiny)
        x = x_ref[...]                                # (M, Cin) f32
        h1 = (dotb(shift_down(x), w1_ref[0]) +
              dotb(x, w1_ref[1]) +
              dotb(shift_up(x), w1_ref[2]) + b1_ref[...])
        out1 = gn_mish(h1, p64, g1_ref[...], be1_ref[...])

        # conv2: Conv1d(k=3, pad=1)
        h2 = (dotb(shift_down(out1), w2_ref[0]) +
              dotb(out1, w2_ref[1]) +
              dotb(shift_up(out1), w2_ref[2]) + b2_ref[...])
        out2 = gn_mish(h2, p64, g2_ref[...], be2_ref[...])
        out3 = out1 + out2

        # ConvTranspose1d(k=3, s=2, pad=1, out_pad=1), packed [even | odd] columns:
        #   even: Y[2i]   = out3[i] @ Wt[:,:,1]
        #   odd : Y[2i+1] = out3[i] @ Wt[:,:,2] + out3[i+1] @ Wt[:,:,0]
        hu = (dotb(out3, wu_ref[0]) +
              dotb(shift_up(out3), wu_ref[1]) + btp_ref[...])
        up = gn_mish(hu, p128, g3_ref[...], be3_ref[...])   # GN over the full 2L length

        # Final Conv1d(k=3, pad=1) on the interleaved sequence, packed [even | odd],
        # all 3 taps fused into one K=384 dot (128-lane-aligned bf16 concat).
        cat = jnp.concatenate([up.astype(jnp.bfloat16),
                               shift_down(up).astype(jnp.bfloat16),
                               shift_up(up).astype(jnp.bfloat16)], axis=-1)   # (M, 384)
        h4 = jnp.dot(cat, w4_ref[...], preferred_element_type=jnp.float32) + b4p_ref[...]
        out_ref[...] = mish(h4)

    return kernel


# --------------------------- wrapper-side packing ----------------------------- #
def _pack_params(params):
    (w1, b1, g1, be1, w2, b2, g2, be2, wt, bt, g3, be3, w4, b4) = params
    C = DIM
    f32, bf16 = jnp.float32, jnp.bfloat16

    # conv1 / conv2: per-tap (Cin, Cout) matrices.
    w1k = jnp.transpose(w1, (2, 1, 0)).astype(bf16)                       # (3, Cin, C)
    w2k = jnp.transpose(w2, (2, 1, 0)).astype(bf16)                       # (3, C, C)

    # ConvTranspose (stride 2), packed [even | odd] output columns.
    z = jnp.zeros((C, C), f32)
    wu_a = jnp.concatenate([wt[:, :, 1], wt[:, :, 2]], axis=1)            # from out3[i]
    wu_b = jnp.concatenate([z, wt[:, :, 0]], axis=1)                      # from out3[i+1]
    wuk = jnp.stack([wu_a, wu_b]).astype(bf16)                            # (2, C, 2C)

    # final conv on the interleaved sequence, packed [even | odd] in/out,
    # 3 taps stacked along K => one (3*2C, 2C) matrix for a single fused dot.
    w4t = jnp.transpose(w4, (2, 1, 0)).astype(f32)                        # (3, Cin, Cout)
    blk_a = jnp.concatenate([jnp.concatenate([w4t[1], w4t[0]], axis=1),
                             jnp.concatenate([w4t[2], w4t[1]], axis=1)], axis=0)  # from up[i]
    blk_b = jnp.concatenate([jnp.concatenate([z, z], axis=1),
                             jnp.concatenate([w4t[0], z], axis=1)], axis=0)       # from up[i-1]
    blk_c = jnp.concatenate([jnp.concatenate([z, w4t[2]], axis=1),
                             jnp.concatenate([z, z], axis=1)], axis=0)            # from up[i+1]
    w4k = jnp.concatenate([blk_a, blk_b, blk_c], axis=0).astype(bf16)     # (6C, 2C) = (384,128)

    row = lambda v: jnp.asarray(v, f32).reshape(1, -1)
    two = lambda v: jnp.concatenate([jnp.asarray(v, f32)] * 2).reshape(1, -1)
    return (w1k, row(b1), row(g1), row(be1),
            w2k, row(b2), row(g2), row(be2),
            wuk, two(bt), two(g3), two(be3),
            w4k, two(b4))


def _gn_consts(L, bblk):
    C, cpg = DIM, DIM // GROUPS
    M = bblk * L
    gid = np.arange(C) // cpg
    p64 = (gid[:, None] == gid[None, :]).astype(np.float32) / (L * cpg)
    gid2 = (np.arange(2 * C) % C) // cpg
    p128 = (gid2[:, None] == gid2[None, :]).astype(np.float32) / (2 * L * cpg)
    r = np.arange(M) % L
    mnf = (r != 0).astype(np.float32).reshape(M, 1)
    mnl = (r != L - 1).astype(np.float32).reshape(M, 1)
    return (jnp.asarray(mnf), jnp.asarray(mnl), jnp.asarray(p64), jnp.asarray(p128))


def simple_up_block(x_ncl, params):
    B, cin, L = x_ncl.shape
    C = DIM
    if L % 8 != 0:
        raise ValueError("L must be a multiple of 8 (sublane alignment)")

    # Row-slab sizing: fill the MXU (target <=512 rows), but prefer a >=2 step
    # grid so v7x's second TensorCore is used whenever slabs can stay >=128 rows.
    bblk = max(1, min(B, 512 // L))
    while (B + bblk - 1) // bblk < 2 and bblk > 1 and (bblk // 2) * L >= 128:
        bblk //= 2
    bpad = ((B + bblk - 1) // bblk) * bblk
    M = bblk * L

    # channels-last rows; conv1 halo taps handled in-kernel (no wrapper tap-concat)
    x = jnp.transpose(x_ncl, (0, 2, 1)).astype(jnp.float32)               # (B, L, Cin)
    if bpad != B:
        x = jnp.pad(x, ((0, bpad - B), (0, 0), (0, 0)))
    x = x.reshape(bpad * L, cin)

    consts = _gn_consts(L, bblk)
    wargs = _pack_params(params)
    args = (x,) + consts + wargs

    in_specs = [pl.BlockSpec((M, cin), lambda i: (i, 0))]
    for a in args[1:]:
        in_specs.append(pl.BlockSpec(a.shape, lambda i, _n=a.ndim: (0,) * _n))

    out = pl.pallas_call(
        _make_kernel(bblk, L),
        grid=(bpad // bblk,),
        in_specs=in_specs,
        out_specs=pl.BlockSpec((M, 2 * C), lambda i: (i, 0)),             # 128-lane dense
        out_shape=jax.ShapeDtypeStruct((bpad * L, 2 * C), jnp.float32),
        compiler_params=pltpu.CompilerParams(
            dimension_semantics=("parallel",),
            vmem_limit_bytes=32 * 1024 * 1024,
        ),
    )(*args)

    out = out[: B * L]                                   # drop batch padding
    y = out.reshape(B, L, 2, C).reshape(B, 2 * L, C)     # interleave even/odd positions
    # TODO(synk): keep channels-last (B, 2L, C) if the consumer permits, to avoid this transpose.
    return jnp.transpose(y, (0, 2, 1))                   # back to PyTorch NCL (B, C, 2L)


# --------------------------- numpy reference (float64) ------------------------ #
def _np_mish(x):
    return x * np.tanh(np.logaddexp(0.0, x))


def _np_conv1d(x, w, b):
    B, Cin, L = x.shape
    Cout, _, K = w.shape
    xp = np.pad(x, ((0, 0), (0, 0), (1, 1)))
    out = np.zeros((B, Cout, L), np.float64)
    for l in range(L):
        out[:, :, l] = np.einsum('bck,ock->bo', xp[:, :, l:l + K], w)
    return out + b[None, :, None]


def _np_groupnorm(x, gamma, beta, groups=GROUPS, eps=EPS):
    B, C, L = x.shape
    xg = x.reshape(B, groups, C // groups, L)
    mean = xg.mean(axis=(2, 3), keepdims=True)
    var = xg.var(axis=(2, 3), keepdims=True)
    xn = ((xg - mean) / np.sqrt(var + eps)).reshape(B, C, L)
    return xn * gamma[None, :, None] + beta[None, :, None]


def _np_convtranspose1d(x, w, b, stride=2, pad=1, opad=1):
    B, Cin, L = x.shape
    _, Cout, K = w.shape
    Lout = (L - 1) * stride - 2 * pad + K + opad
    out = np.zeros((B, Cout, Lout), np.float64)
    for i in range(L):
        for k in range(K):
            o = i * stride - pad + k
            if 0 <= o < Lout:
                out[:, :, o] += np.einsum('bc,cd->bd', x[:, :, i], w[:, :, k])
    return out + b[None, :, None]


def _ref_forward(x, p):
    (w1, b1, g1, be1, w2, b2, g2, be2, wt, bt, g3, be3, w4, b4) = [
        np.asarray(a, np.float64) for a in p]
    x = np.asarray(x, np.float64)
    out1 = _np_mish(_np_groupnorm(_np_conv1d(x, w1, b1), g1, be1))
    out2 = _np_mish(_np_groupnorm(_np_conv1d(out1, w2, b2), g2, be2))
    out3 = out1 + out2
    u = _np_mish(_np_groupnorm(_np_convtranspose1d(out3, wt, bt), g3, be3))
    return _np_mish(_np_conv1d(u, w4, b4))


# ------------------------------------ main ------------------------------------ #
if __name__ == "__main__":
    key = jax.random.PRNGKey(0)
    B, Cin, L = 2, 4, 16
    C = DIM
    ks = jax.random.split(key, 16)

    def nrm(k, shape, scale=0.1):
        return (scale * jax.random.normal(k, shape)).astype(jnp.float32)

    x = jax.random.normal(ks[0], (B, Cin, L), jnp.float32)
    w1 = nrm(ks[1], (C, Cin, 3), 0.3); b1 = nrm(ks[2], (C,))
    g1 = 1.0 + nrm(ks[3], (C,));       be1 = nrm(ks[4], (C,))
    w2 = nrm(ks[5], (C, C, 3));        b2 = nrm(ks[6], (C,))
    g2 = 1.0 + nrm(ks[7], (C,));       be2 = nrm(ks[8], (C,))
    wt = nrm(ks[9], (C, C, 3));        bt = nrm(ks[10], (C,))
    g3 = 1.0 + nrm(ks[11], (C,));      be3 = nrm(ks[12], (C,))
    w4 = nrm(ks[13], (C, C, 3));       b4 = nrm(ks[14], (C,))
    params = (w1, b1, g1, be1, w2, b2, g2, be2, wt, bt, g3, be3, w4, b4)

    out = jax.jit(simple_up_block)(x, params)
    out = jax.block_until_ready(out)
    assert out.shape == (B, C, 2 * L), out.shape

    ref = _ref_forward(np.asarray(x), params)
    out_np = np.asarray(out, np.float64)
    # bf16 single-pass conv matmuls + approx reciprocal in Mish => compare with
    # bf16-appropriate bounds against the f64 reference.
    rel_rms = np.linalg.norm(out_np - ref) / np.linalg.norm(ref)
    assert rel_rms < 4e-2, f"relative RMS error too high: {rel_rms}"
    np.testing.assert_allclose(out_np, ref, rtol=5e-2, atol=1e-1)
    print("KERNEL_OK")
</pallas_src>

<mosaic_0001>
module attributes {stable_mosaic.version = 11 : i64} {
  func.func @kernel(%arg0: i32, %arg1: memref<32x4xf32, #tpu.memory_space<vmem>>, %arg2: memref<32x1xf32, #tpu.memory_space<vmem>>, %arg3: memref<32x1xf32, #tpu.memory_space<vmem>>, %arg4: memref<64x64xf32, #tpu.memory_space<vmem>>, %arg5: memref<128x128xf32, #tpu.memory_space<vmem>>, %arg6: memref<3x4x64xbf16, #tpu.memory_space<vmem>>, %arg7: memref<1x64xf32, #tpu.memory_space<vmem>>, %arg8: memref<1x64xf32, #tpu.memory_space<vmem>>, %arg9: memref<1x64xf32, #tpu.memory_space<vmem>>, %arg10: memref<3x64x64xbf16, #tpu.memory_space<vmem>>, %arg11: memref<1x64xf32, #tpu.memory_space<vmem>>, %arg12: memref<1x64xf32, #tpu.memory_space<vmem>>, %arg13: memref<1x64xf32, #tpu.memory_space<vmem>>, %arg14: memref<2x64x128xbf16, #tpu.memory_space<vmem>>, %arg15: memref<1x128xf32, #tpu.memory_space<vmem>>, %arg16: memref<1x128xf32, #tpu.memory_space<vmem>>, %arg17: memref<1x128xf32, #tpu.memory_space<vmem>>, %arg18: memref<384x128xbf16, #tpu.memory_space<vmem>>, %arg19: memref<1x128xf32, #tpu.memory_space<vmem>>, %arg20: memref<32x128xf32, #tpu.memory_space<vmem>>) attributes {dimension_semantics = [#tpu.dimension_semantics<parallel>], iteration_bounds = array<i64: 1>, scalar_prefetch = 0 : i64, scratch_operands = 0 : i64, tpu.core_type = #tpu.core_type<tc>, window_params = [{transform_indices = @transform_0, window_bounds = array<i64: 32, 4>}, {pipeline_mode = #tpu.pipeline_mode<synchronous>, transform_indices = @transform_1, window_bounds = array<i64: 32, 1>}, {pipeline_mode = #tpu.pipeline_mode<synchronous>, transform_indices = @transform_2, window_bounds = array<i64: 32, 1>}, {pipeline_mode = #tpu.pipeline_mode<synchronous>, transform_indices = @transform_3, window_bounds = array<i64: 64, 64>}, {pipeline_mode = #tpu.pipeline_mode<synchronous>, transform_indices = @transform_4, window_bounds = array<i64: 128, 128>}, {pipeline_mode = #tpu.pipeline_mode<synchronous>, transform_indices = @transform_5, window_bounds = array<i64: 3, 4, 64>}, {pipeline_mode = #tpu.pipeline_mode<synchronous>, transform_indices = @transform_6, window_bounds = array<i64: 1, 64>}, {pipeline_mode = #tpu.pipeline_mode<synchronous>, transform_indices = @transform_7, window_bounds = array<i64: 1, 64>}, {pipeline_mode = #tpu.pipeline_mode<synchronous>, transform_indices = @transform_8, window_bounds = array<i64: 1, 64>}, {pipeline_mode = #tpu.pipeline_mode<synchronous>, transform_indices = @transform_9, window_bounds = array<i64: 3, 64, 64>}, {pipeline_mode = #tpu.pipeline_mode<synchronous>, transform_indices = @transform_10, window_bounds = array<i64: 1, 64>}, {pipeline_mode = #tpu.pipeline_mode<synchronous>, transform_indices = @transform_11, window_bounds = array<i64: 1, 64>}, {pipeline_mode = #tpu.pipeline_mode<synchronous>, transform_indices = @transform_12, window_bounds = array<i64: 1, 64>}, {pipeline_mode = #tpu.pipeline_mode<synchronous>, transform_indices = @transform_13, window_bounds = array<i64: 2, 64, 128>}, {pipeline_mode = #tpu.pipeline_mode<synchronous>, transform_indices = @transform_14, window_bounds = array<i64: 1, 128>}, {pipeline_mode = #tpu.pipeline_mode<synchronous>, transform_indices = @transform_15, window_bounds = array<i64: 1, 128>}, {pipeline_mode = #tpu.pipeline_mode<synchronous>, transform_indices = @transform_16, window_bounds = array<i64: 1, 128>}, {pipeline_mode = #tpu.pipeline_mode<synchronous>, transform_indices = @transform_17, window_bounds = array<i64: 384, 128>}, {pipeline_mode = #tpu.pipeline_mode<synchronous>, transform_indices = @transform_18, window_bounds = array<i64: 1, 128>}, {transform_indices = @transform_19, window_bounds = array<i64: 32, 128>}]} {
    %c0 = arith.constant 0 : index
    %c0_0 = arith.constant 0 : index
    %0 = vector.load %arg2[%c0, %c0_0] : memref<32x1xf32, #tpu.memory_space<vmem>>, vector<32x1xf32>
    %c0_1 = arith.constant 0 : index
    %c0_2 = arith.constant 0 : index
    %1 = vector.load %arg3[%c0_1, %c0_2] : memref<32x1xf32, #tpu.memory_space<vmem>>, vector<32x1xf32>
    %c0_3 = arith.constant 0 : index
    %c0_4 = arith.constant 0 : index
    %2 = vector.load %arg4[%c0_3, %c0_4] : memref<64x64xf32, #tpu.memory_space<vmem>>, vector<64x64xf32>
    %c0_5 = arith.constant 0 : index
    %c0_6 = arith.constant 0 : index
    %3 = vector.load %arg5[%c0_5, %c0_6] : memref<128x128xf32, #tpu.memory_space<vmem>>, vector<128x128xf32>
    %c0_7 = arith.constant 0 : index
    %c0_8 = arith.constant 0 : index
    %4 = vector.load %arg1[%c0_7, %c0_8] : memref<32x4xf32, #tpu.memory_space<vmem>>, vector<32x4xf32>
    %c1_i32 = arith.constant 1 : i32
    %5 = tpu.dynamic_rotate %4 by %c1_i32 dim 0 : vector<32x4xf32>, i32 -> vector<32x4xf32>
    %6 = vector.broadcast %0 : vector<32x1xf32> to vector<32x4xf32>
    %7 = arith.mulf %5, %6 : vector<32x4xf32>
    %c0_9 = arith.constant 0 : index
    %c0_10 = arith.constant 0 : index
    %c0_11 = arith.constant 0 : index
    %8 = vector.load %arg6[%c0_9, %c0_10, %c0_11] : memref<3x4x64xbf16, #tpu.memory_space<vmem>>, vector<1x4x64xbf16>
    %9 = vector.shape_cast %8 : vector<1x4x64xbf16> to vector<4x64xbf16>
    %10 = arith.truncf %7 : vector<32x4xf32> to vector<32x4xbf16>
    %cst = arith.constant dense<0.000000e+00> : vector<32x64xf32>
    %11 = tpu.matmul %10, %9, %cst {dimension_numbers = #tpu.dot_dimension_numbers<[1], [0], [0], [1], [0, 0, 1, 1], [], []>} : vector<32x4xbf16>, vector<4x64xbf16>, vector<32x64xf32> -> vector<32x64xf32>
    %c1 = arith.constant 1 : index
    %c0_12 = arith.constant 0 : index
    %c0_13 = arith.constant 0 : index
    %12 = vector.load %arg6[%c1, %c0_12, %c0_13] : memref<3x4x64xbf16, #tpu.memory_space<vmem>>, vector<1x4x64xbf16>
    %13 = vector.shape_cast %12 : vector<1x4x64xbf16> to vector<4x64xbf16>
    %14 = arith.truncf %4 : vector<32x4xf32> to vector<32x4xbf16>
    %cst_14 = arith.constant dense<0.000000e+00> : vector<32x64xf32>
    %15 = tpu.matmul %14, %13, %cst_14 {dimension_numbers = #tpu.dot_dimension_numbers<[1], [0], [0], [1], [0, 0, 1, 1], [], []>} : vector<32x4xbf16>, vector<4x64xbf16>, vector<32x64xf32> -> vector<32x64xf32>
    %16 = arith.addf %11, %15 : vector<32x64xf32>
    %c31_i32 = arith.constant 31 : i32
    %17 = tpu.dynamic_rotate %4 by %c31_i32 dim 0 : vector<32x4xf32>, i32 -> vector<32x4xf32>
    %18 = vector.broadcast %1 : vector<32x1xf32> to vector<32x4xf32>
    %19 = arith.mulf %17, %18 : vector<32x4xf32>
    %c2 = arith.constant 2 : index
    %c0_15 = arith.constant 0 : index
    %c0_16 = arith.constant 0 : index
    %20 = vector.load %arg6[%c2, %c0_15, %c0_16] : memref<3x4x64xbf16, #tpu.memory_space<vmem>>, vector<1x4x64xbf16>
    %21 = vector.shape_cast %20 : vector<1x4x64xbf16> to vector<4x64xbf16>
    %22 = arith.truncf %19 : vector<32x4xf32> to vector<32x4xbf16>
    %cst_17 = arith.constant dense<0.000000e+00> : vector<32x64xf32>
    %23 = tpu.matmul %22, %21, %cst_17 {dimension_numbers = #tpu.dot_dimension_numbers<[1], [0], [0], [1], [0, 0, 1, 1], [], []>} : vector<32x4xbf16>, vector<4x64xbf16>, vector<32x64xf32> -> vector<32x64xf32>
    %24 = arith.addf %16, %23 : vector<32x64xf32>
    %c0_18 = arith.constant 0 : index
    %c0_19 = arith.constant 0 : index
    %25 = vector.load %arg7[%c0_18, %c0_19] : memref<1x64xf32, #tpu.memory_space<vmem>>, vector<1x64xf32>
    %26 = vector.broadcast %25 : vector<1x64xf32> to vector<32x64xf32>
    %27 = arith.addf %24, %26 : vector<32x64xf32>
    %c0_20 = arith.constant 0 : index
    %c0_21 = arith.constant 0 : index
    %28 = vector.load %arg8[%c0_20, %c0_21] : memref<1x64xf32, #tpu.memory_space<vmem>>, vector<1x64xf32>
    %c0_22 = arith.constant 0 : index
    %c0_23 = arith.constant 0 : index
    %29 = vector.load %arg9[%c0_22, %c0_23] : memref<1x64xf32, #tpu.memory_space<vmem>>, vector<1x64xf32>
    %30 = vector.shape_cast %27 : vector<32x64xf32> to vector<2x16x64xf32>
    %cst_24 = arith.constant dense<0.000000e+00> : vector<2x64xf32>
    %31 = vector.multi_reduction <add>, %30, %cst_24 [1] : vector<2x16x64xf32> to vector<2x64xf32>
    %32 = arith.mulf %30, %30 : vector<2x16x64xf32>
    %cst_25 = arith.constant dense<0.000000e+00> : vector<2x64xf32>
    %33 = vector.multi_reduction <add>, %32, %cst_25 [1] : vector<2x16x64xf32> to vector<2x64xf32>
    %cst_26 = arith.constant dense<0.000000e+00> : vector<2x64xf32>
    %34 = tpu.matmul %31, %2, %cst_26 {dimension_numbers = #tpu.dot_dimension_numbers<[1], [0], [0], [1], [0, 0, 1, 1], [], []>, precision = #tpu.contract_precision<fp32>} : vector<2x64xf32>, vector<64x64xf32>, vector<2x64xf32> -> vector<2x64xf32>
    %cst_27 = arith.constant dense<0.000000e+00> : vector<2x64xf32>
    %35 = tpu.matmul %33, %2, %cst_27 {dimension_numbers = #tpu.dot_dimension_numbers<[1], [0], [0], [1], [0, 0, 1, 1], [], []>, precision = #tpu.contract_precision<fp32>} : vector<2x64xf32>, vector<64x64xf32>, vector<2x64xf32> -> vector<2x64xf32>
    %36 = arith.mulf %34, %34 : vector<2x64xf32>
    %37 = arith.subf %35, %36 : vector<2x64xf32>
    %cst_28 = arith.constant 0.000000e+00 : f32
    %38 = vector.broadcast %cst_28 : f32 to vector<2x64xf32>
    %39 = arith.maximumf %37, %38 : vector<2x64xf32>
    %cst_29 = arith.constant 9.99999974E-6 : f32
    %40 = vector.broadcast %cst_29 : f32 to vector<2x64xf32>
    %41 = arith.addf %39, %40 : vector<2x64xf32>
    %42 = math.rsqrt %41 : vector<2x64xf32>
    %43 = vector.broadcast %28 : vector<1x64xf32> to vector<2x64xf32>
    %44 = arith.mulf %42, %43 : vector<2x64xf32>
    %45 = arith.mulf %34, %44 : vector<2x64xf32>
    %46 = vector.broadcast %29 : vector<1x64xf32> to vector<2x64xf32>
    %47 = arith.subf %46, %45 : vector<2x64xf32>
    %48 = vector.shape_cast %44 : vector<2x64xf32> to vector<2x1x64xf32>
    %49 = vector.broadcast %48 : vector<2x1x64xf32> to vector<2x16x64xf32>
    %50 = arith.mulf %30, %49 : vector<2x16x64xf32>
    %51 = vector.shape_cast %47 : vector<2x64xf32> to vector<2x1x64xf32>
    %52 = vector.broadcast %51 : vector<2x1x64xf32> to vector<2x16x64xf32>
    %53 = arith.addf %50, %52 : vector<2x16x64xf32>
    %54 = vector.shape_cast %53 : vector<2x16x64xf32> to vector<32x64xf32>
    %cst_30 = arith.constant 3.000000e+01 : f32
    %55 = vector.broadcast %cst_30 : f32 to vector<32x64xf32>
    %56 = arith.minimumf %54, %55 : vector<32x64xf32>
    %57 = math.exp %56 : vector<32x64xf32>
    %cst_31 = arith.constant 2.000000e+00 : f32
    %58 = vector.broadcast %cst_31 : f32 to vector<32x64xf32>
    %59 = arith.addf %57, %58 : vector<32x64xf32>
    %60 = arith.mulf %57, %59 : vector<32x64xf32>
    %cst_32 = arith.constant 2.000000e+00 : f32
    %61 = vector.broadcast %cst_32 : f32 to vector<32x64xf32>
    %62 = arith.addf %60, %61 : vector<32x64xf32>
    %63 = tpu.reciprocal %62 {approx = true} : vector<32x64xf32> -> vector<32x64xf32>
    %cst_33 = arith.constant 2.000000e+00 : f32
    %64 = vector.broadcast %cst_33 : f32 to vector<32x64xf32>
    %65 = arith.mulf %64, %63 : vector<32x64xf32>
    %cst_34 = arith.constant 1.000000e+00 : f32
    %66 = vector.broadcast %cst_34 : f32 to vector<32x64xf32>
    %67 = arith.subf %66, %65 : vector<32x64xf32>
    %68 = arith.mulf %54, %67 : vector<32x64xf32>
    %c1_i32_35 = arith.constant 1 : i32
    %69 = tpu.dynamic_rotate %68 by %c1_i32_35 dim 0 : vector<32x64xf32>, i32 -> vector<32x64xf32>
    %70 = vector.broadcast %0 : vector<32x1xf32> to vector<32x64xf32>
    %71 = arith.mulf %69, %70 : vector<32x64xf32>
    %c0_36 = arith.constant 0 : index
    %c0_37 = arith.constant 0 : index
    %c0_38 = arith.constant 0 : index
    %72 = vector.load %arg10[%c0_36, %c0_37, %c0_38] : memref<3x64x64xbf16, #tpu.memory_space<vmem>>, vector<1x64x64xbf16>
    %73 = vector.shape_cast %72 : vector<1x64x64xbf16> to vector<64x64xbf16>
    %74 = arith.truncf %71 : vector<32x64xf32> to vector<32x64xbf16>
    %cst_39 = arith.constant dense<0.000000e+00> : vector<32x64xf32>
    %75 = tpu.matmul %74, %73, %cst_39 {dimension_numbers = #tpu.dot_dimension_numbers<[1], [0], [0], [1], [0, 0, 1, 1], [], []>} : vector<32x64xbf16>, vector<64x64xbf16>, vector<32x64xf32> -> vector<32x64xf32>
    %c1_40 = arith.constant 1 : index
    %c0_41 = arith.constant 0 : index
    %c0_42 = arith.constant 0 : index
    %76 = vector.load %arg10[%c1_40, %c0_41, %c0_42] : memref<3x64x64xbf16, #tpu.memory_space<vmem>>, vector<1x64x64xbf16>
    %77 = vector.shape_cast %76 : vector<1x64x64xbf16> to vector<64x64xbf16>
    %78 = arith.truncf %68 : vector<32x64xf32> to vector<32x64xbf16>
    %cst_43 = arith.constant dense<0.000000e+00> : vector<32x64xf32>
    %79 = tpu.matmul %78, %77, %cst_43 {dimension_numbers = #tpu.dot_dimension_numbers<[1], [0], [0], [1], [0, 0, 1, 1], [], []>} : vector<32x64xbf16>, vector<64x64xbf16>, vector<32x64xf32> -> vector<32x64xf32>
    %80 = arith.addf %75, %79 : vector<32x64xf32>
    %c31_i32_44 = arith.constant 31 : i32
    %81 = tpu.dynamic_rotate %68 by %c31_i32_44 dim 0 : vector<32x64xf32>, i32 -> vector<32x64xf32>
    %82 = vector.broadcast %1 : vector<32x1xf32> to vector<32x64xf32>
    %83 = arith.mulf %81, %82 : vector<32x64xf32>
    %c2_45 = arith.constant 2 : index
    %c0_46 = arith.constant 0 : index
    %c0_47 = arith.constant 0 : index
    %84 = vector.load %arg10[%c2_45, %c0_46, %c0_47] : memref<3x64x64xbf16, #tpu.memory_space<vmem>>, vector<1x64x64xbf16>
    %85 = vector.shape_cast %84 : vector<1x64x64xbf16> to vector<64x64xbf16>
    %86 = arith.truncf %83 : vector<32x64xf32> to vector<32x64xbf16>
    %cst_48 = arith.constant dense<0.000000e+00> : vector<32x64xf32>
    %87 = tpu.matmul %86, %85, %cst_48 {dimension_numbers = #tpu.dot_dimension_numbers<[1], [0], [0], [1], [0, 0, 1, 1], [], []>} : vector<32x64xbf16>, vector<64x64xbf16>, vector<32x64xf32> -> vector<32x64xf32>
    %88 = arith.addf %80, %87 : vector<32x64xf32>
    %c0_49 = arith.constant 0 : index
    %c0_50 = arith.constant 0 : index
    %89 = vector.load %arg11[%c0_49, %c0_50] : memref<1x64xf32, #tpu.memory_space<vmem>>, vector<1x64xf32>
    %90 = vector.broadcast %89 : vector<1x64xf32> to vector<32x64xf32>
    %91 = arith.addf %88, %90 : vector<32x64xf32>
    %c0_51 = arith.constant 0 : index
    %c0_52 = arith.constant 0 : index
    %92 = vector.load %arg12[%c0_51, %c0_52] : memref<1x64xf32, #tpu.memory_space<vmem>>, vector<1x64xf32>
    %c0_53 = arith.constant 0 : index
    %c0_54 = arith.constant 0 : index
    %93 = vector.load %arg13[%c0_53, %c0_54] : memref<1x64xf32, #tpu.memory_space<vmem>>, vector<1x64xf32>
    %94 = vector.shape_cast %91 : vector<32x64xf32> to vector<2x16x64xf32>
    %cst_55 = arith.constant dense<0.000000e+00> : vector<2x64xf32>
    %95 = vector.multi_reduction <add>, %94, %cst_55 [1] : vector<2x16x64xf32> to vector<2x64xf32>
    %96 = arith.mulf %94, %94 : vector<2x16x64xf32>
    %cst_56 = arith.constant dense<0.000000e+00> : vector<2x64xf32>
    %97 = vector.multi_reduction <add>, %96, %cst_56 [1] : vector<2x16x64xf32> to vector<2x64xf32>
    %cst_57 = arith.constant dense<0.000000e+00> : vector<2x64xf32>
    %98 = tpu.matmul %95, %2, %cst_57 {dimension_numbers = #tpu.dot_dimension_numbers<[1], [0], [0], [1], [0, 0, 1, 1], [], []>, precision = #tpu.contract_precision<fp32>} : vector<2x64xf32>, vector<64x64xf32>, vector<2x64xf32> -> vector<2x64xf32>
    %cst_58 = arith.constant dense<0.000000e+00> : vector<2x64xf32>
    %99 = tpu.matmul %97, %2, %cst_58 {dimension_numbers = #tpu.dot_dimension_numbers<[1], [0], [0], [1], [0, 0, 1, 1], [], []>, precision = #tpu.contract_precision<fp32>} : vector<2x64xf32>, vector<64x64xf32>, vector<2x64xf32> -> vector<2x64xf32>
    %100 = arith.mulf %98, %98 : vector<2x64xf32>
    %101 = arith.subf %99, %100 : vector<2x64xf32>
    %cst_59 = arith.constant 0.000000e+00 : f32
    %102 = vector.broadcast %cst_59 : f32 to vector<2x64xf32>
    %103 = arith.maximumf %101, %102 : vector<2x64xf32>
    %cst_60 = arith.constant 9.99999974E-6 : f32
    %104 = vector.broadcast %cst_60 : f32 to vector<2x64xf32>
    %105 = arith.addf %103, %104 : vector<2x64xf32>
    %106 = math.rsqrt %105 : vector<2x64xf32>
    %107 = vector.broadcast %92 : vector<1x64xf32> to vector<2x64xf32>
    %108 = arith.mulf %106, %107 : vector<2x64xf32>
    %109 = arith.mulf %98, %108 : vector<2x64xf32>
    %110 = vector.broadcast %93 : vector<1x64xf32> to vector<2x64xf32>
    %111 = arith.subf %110, %109 : vector<2x64xf32>
    %112 = vector.shape_cast %108 : vector<2x64xf32> to vector<2x1x64xf32>
    %113 = vector.broadcast %112 : vector<2x1x64xf32> to vector<2x16x64xf32>
    %114 = arith.mulf %94, %113 : vector<2x16x64xf32>
    %115 = vector.shape_cast %111 : vector<2x64xf32> to vector<2x1x64xf32>
    %116 = vector.broadcast %115 : vector<2x1x64xf32> to vector<2x16x64xf32>
    %117 = arith.addf %114, %116 : vector<2x16x64xf32>
    %118 = vector.shape_cast %117 : vector<2x16x64xf32> to vector<32x64xf32>
    %cst_61 = arith.constant 3.000000e+01 : f32
    %119 = vector.broadcast %cst_61 : f32 to vector<32x64xf32>
    %120 = arith.minimumf %118, %119 : vector<32x64xf32>
    %121 = math.exp %120 : vector<32x64xf32>
    %cst_62 = arith.constant 2.000000e+00 : f32
    %122 = vector.broadcast %cst_62 : f32 to vector<32x64xf32>
    %123 = arith.addf %121, %122 : vector<32x64xf32>
    %124 = arith.mulf %121, %123 : vector<32x64xf32>
    %cst_63 = arith.constant 2.000000e+00 : f32
    %125 = vector.broadcast %cst_63 : f32 to vector<32x64xf32>
    %126 = arith.addf %124, %125 : vector<32x64xf32>
    %127 = tpu.reciprocal %126 {approx = true} : vector<32x64xf32> -> vector<32x64xf32>
    %cst_64 = arith.constant 2.000000e+00 : f32
    %128 = vector.broadcast %cst_64 : f32 to vector<32x64xf32>
    %129 = arith.mulf %128, %127 : vector<32x64xf32>
    %cst_65 = arith.constant 1.000000e+00 : f32
    %130 = vector.broadcast %cst_65 : f32 to vector<32x64xf32>
    %131 = arith.subf %130, %129 : vector<32x64xf32>
    %132 = arith.mulf %118, %131 : vector<32x64xf32>
    %133 = arith.addf %68, %132 : vector<32x64xf32>
    %c0_66 = arith.constant 0 : index
    %c0_67 = arith.constant 0 : index
    %c0_68 = arith.constant 0 : index
    %134 = vector.load %arg14[%c0_66, %c0_67, %c0_68] : memref<2x64x128xbf16, #tpu.memory_space<vmem>>, vector<1x64x128xbf16>
    %135 = vector.shape_cast %134 : vector<1x64x128xbf16> to vector<64x128xbf16>
    %136 = arith.truncf %133 : vector<32x64xf32> to vector<32x64xbf16>
    %cst_69 = arith.constant dense<0.000000e+00> : vector<32x128xf32>
    %137 = tpu.matmul %136, %135, %cst_69 {dimension_numbers = #tpu.dot_dimension_numbers<[1], [0], [0], [1], [0, 0, 1, 1], [], []>} : vector<32x64xbf16>, vector<64x128xbf16>, vector<32x128xf32> -> vector<32x128xf32>
    %c31_i32_70 = arith.constant 31 : i32
    %138 = tpu.dynamic_rotate %133 by %c31_i32_70 dim 0 : vector<32x64xf32>, i32 -> vector<32x64xf32>
    %139 = vector.broadcast %1 : vector<32x1xf32> to vector<32x64xf32>
    %140 = arith.mulf %138, %139 : vector<32x64xf32>
    %c1_71 = arith.constant 1 : index
    %c0_72 = arith.constant 0 : index
    %c0_73 = arith.constant 0 : index
    %141 = vector.load %arg14[%c1_71, %c0_72, %c0_73] : memref<2x64x128xbf16, #tpu.memory_space<vmem>>, vector<1x64x128xbf16>
    %142 = vector.shape_cast %141 : vector<1x64x128xbf16> to vector<64x128xbf16>
    %143 = arith.truncf %140 : vector<32x64xf32> to vector<32x64xbf16>
    %cst_74 = arith.constant dense<0.000000e+00> : vector<32x128xf32>
    %144 = tpu.matmul %143, %142, %cst_74 {dimension_numbers = #tpu.dot_dimension_numbers<[1], [0], [0], [1], [0, 0, 1, 1], [], []>} : vector<32x64xbf16>, vector<64x128xbf16>, vector<32x128xf32> -> vector<32x128xf32>
    %145 = arith.addf %137, %144 : vector<32x128xf32>
    %c0_75 = arith.constant 0 : index
    %c0_76 = arith.constant 0 : index
    %146 = vector.load %arg15[%c0_75, %c0_76] : memref<1x128xf32, #tpu.memory_space<vmem>>, vector<1x128xf32>
    %147 = vector.broadcast %146 : vector<1x128xf32> to vector<32x128xf32>
    %148 = arith.addf %145, %147 : vector<32x128xf32>
    %c0_77 = arith.constant 0 : index
    %c0_78 = arith.constant 0 : index
    %149 = vector.load %arg16[%c0_77, %c0_78] : memref<1x128xf32, #tpu.memory_space<vmem>>, vector<1x128xf32>
    %c0_79 = arith.constant 0 : index
    %c0_80 = arith.constant 0 : index
    %150 = vector.load %arg17[%c0_79, %c0_80] : memref<1x128xf32, #tpu.memory_space<vmem>>, vector<1x128xf32>
    %151 = vector.shape_cast %148 : vector<32x128xf32> to vector<2x16x128xf32>
    %cst_81 = arith.constant dense<0.000000e+00> : vector<2x128xf32>
    %152 = vector.multi_reduction <add>, %151, %cst_81 [1] : vector<2x16x128xf32> to vector<2x128xf32>
    %153 = arith.mulf %151, %151 : vector<2x16x128xf32>
    %cst_82 = arith.constant dense<0.000000e+00> : vector<2x128xf32>
    %154 = vector.multi_reduction <add>, %153, %cst_82 [1] : vector<2x16x128xf32> to vector<2x128xf32>
    %cst_83 = arith.constant dense<0.000000e+00> : vector<2x128xf32>
    %155 = tpu.matmul %152, %3, %cst_83 {dimension_numbers = #tpu.dot_dimension_numbers<[1], [0], [0], [1], [0, 0, 1, 1], [], []>, precision = #tpu.contract_precision<fp32>} : vector<2x128xf32>, vector<128x128xf32>, vector<2x128xf32> -> vector<2x128xf32>
    %cst_84 = arith.constant dense<0.000000e+00> : vector<2x128xf32>
    %156 = tpu.matmul %154, %3, %cst_84 {dimension_numbers = #tpu.dot_dimension_numbers<[1], [0], [0], [1], [0, 0, 1, 1], [], []>, precision = #tpu.contract_precision<fp32>} : vector<2x128xf32>, vector<128x128xf32>, vector<2x128xf32> -> vector<2x128xf32>
    %157 = arith.mulf %155, %155 : vector<2x128xf32>
    %158 = arith.subf %156, %157 : vector<2x128xf32>
    %cst_85 = arith.constant 0.000000e+00 : f32
    %159 = vector.broadcast %cst_85 : f32 to vector<2x128xf32>
    %160 = arith.maximumf %158, %159 : vector<2x128xf32>
    %cst_86 = arith.constant 9.99999974E-6 : f32
    %161 = vector.broadcast %cst_86 : f32 to vector<2x128xf32>
    %162 = arith.addf %160, %161 : vector<2x128xf32>
    %163 = math.rsqrt %162 : vector<2x128xf32>
    %164 = vector.broadcast %149 : vector<1x128xf32> to vector<2x128xf32>
    %165 = arith.mulf %163, %164 : vector<2x128xf32>
    %166 = arith.mulf %155, %165 : vector<2x128xf32>
    %167 = vector.broadcast %150 : vector<1x128xf32> to vector<2x128xf32>
    %168 = arith.subf %167, %166 : vector<2x128xf32>
    %169 = vector.shape_cast %165 : vector<2x128xf32> to vector<2x1x128xf32>
    %170 = vector.broadcast %169 : vector<2x1x128xf32> to vector<2x16x128xf32>
    %171 = arith.mulf %151, %170 : vector<2x16x128xf32>
    %172 = vector.shape_cast %168 : vector<2x128xf32> to vector<2x1x128xf32>
    %173 = vector.broadcast %172 : vector<2x1x128xf32> to vector<2x16x128xf32>
    %174 = arith.addf %171, %173 : vector<2x16x128xf32>
    %175 = vector.shape_cast %174 : vector<2x16x128xf32> to vector<32x128xf32>
    %cst_87 = arith.constant 3.000000e+01 : f32
    %176 = vector.broadcast %cst_87 : f32 to vector<32x128xf32>
    %177 = arith.minimumf %175, %176 : vector<32x128xf32>
    %178 = math.exp %177 : vector<32x128xf32>
    %cst_88 = arith.constant 2.000000e+00 : f32
    %179 = vector.broadcast %cst_88 : f32 to vector<32x128xf32>
    %180 = arith.addf %178, %179 : vector<32x128xf32>
    %181 = arith.mulf %178, %180 : vector<32x128xf32>
    %cst_89 = arith.constant 2.000000e+00 : f32
    %182 = vector.broadcast %cst_89 : f32 to vector<32x128xf32>
    %183 = arith.addf %181, %182 : vector<32x128xf32>
    %184 = tpu.reciprocal %183 {approx = true} : vector<32x128xf32> -> vector<32x128xf32>
    %cst_90 = arith.constant 2.000000e+00 : f32
    %185 = vector.broadcast %cst_90 : f32 to vector<32x128xf32>
    %186 = arith.mulf %185, %184 : vector<32x128xf32>
    %cst_91 = arith.constant 1.000000e+00 : f32
    %187 = vector.broadcast %cst_91 : f32 to vector<32x128xf32>
    %188 = arith.subf %187, %186 : vector<32x128xf32>
    %189 = arith.mulf %175, %188 : vector<32x128xf32>
    %190 = arith.truncf %189 : vector<32x128xf32> to vector<32x128xbf16>
    %c1_i32_92 = arith.constant 1 : i32
    %191 = tpu.dynamic_rotate %189 by %c1_i32_92 dim 0 : vector<32x128xf32>, i32 -> vector<32x128xf32>
    %192 = vector.broadcast %0 : vector<32x1xf32> to vector<32x128xf32>
    %193 = arith.mulf %191, %192 : vector<32x128xf32>
    %194 = arith.truncf %193 : vector<32x128xf32> to vector<32x128xbf16>
    %c31_i32_93 = arith.constant 31 : i32
    %195 = tpu.dynamic_rotate %189 by %c31_i32_93 dim 0 : vector<32x128xf32>, i32 -> vector<32x128xf32>
    %196 = vector.broadcast %1 : vector<32x1xf32> to vector<32x128xf32>
    %197 = arith.mulf %195, %196 : vector<32x128xf32>
    %198 = arith.truncf %197 : vector<32x128xf32> to vector<32x128xbf16>
    %199 = tpu.concatenate %190, %194, %198 in 1 : vector<32x128xbf16>, vector<32x128xbf16>, vector<32x128xbf16> -> vector<32x384xbf16>
    %c0_94 = arith.constant 0 : index
    %c0_95 = arith.constant 0 : index
    %200 = vector.load %arg18[%c0_94, %c0_95] : memref<384x128xbf16, #tpu.memory_space<vmem>>, vector<384x128xbf16>
    %cst_96 = arith.constant dense<0.000000e+00> : vector<32x128xf32>
    %201 = tpu.matmul %199, %200, %cst_96 {dimension_numbers = #tpu.dot_dimension_numbers<[1], [0], [0], [1], [0, 0, 1, 1], [], []>} : vector<32x384xbf16>, vector<384x128xbf16>, vector<32x128xf32> -> vector<32x128xf32>
    %c0_97 = arith.constant 0 : index
    %c0_98 = arith.constant 0 : index
    %202 = vector.load %arg19[%c0_97, %c0_98] : memref<1x128xf32, #tpu.memory_space<vmem>>, vector<1x128xf32>
    %203 = vector.broadcast %202 : vector<1x128xf32> to vector<32x128xf32>
    %204 = arith.addf %201, %203 : vector<32x128xf32>
    %cst_99 = arith.constant 3.000000e+01 : f32
    %205 = vector.broadcast %cst_99 : f32 to vector<32x128xf32>
    %206 = arith.minimumf %204, %205 : vector<32x128xf32>
    %207 = math.exp %206 : vector<32x128xf32>
    %cst_100 = arith.constant 2.000000e+00 : f32
    %208 = vector.broadcast %cst_100 : f32 to vector<32x128xf32>
    %209 = arith.addf %207, %208 : vector<32x128xf32>
    %210 = arith.mulf %207, %209 : vector<32x128xf32>
    %cst_101 = arith.constant 2.000000e+00 : f32
    %211 = vector.broadcast %cst_101 : f32 to vector<32x128xf32>
    %212 = arith.addf %210, %211 : vector<32x128xf32>
    %213 = tpu.reciprocal %212 {approx = true} : vector<32x128xf32> -> vector<32x128xf32>
    %cst_102 = arith.constant 2.000000e+00 : f32
    %214 = vector.broadcast %cst_102 : f32 to vector<32x128xf32>
    %215 = arith.mulf %214, %213 : vector<32x128xf32>
    %cst_103 = arith.constant 1.000000e+00 : f32
    %216 = vector.broadcast %cst_103 : f32 to vector<32x128xf32>
    %217 = arith.subf %216, %215 : vector<32x128xf32>
    %218 = arith.mulf %204, %217 : vector<32x128xf32>
    %c0_104 = arith.constant 0 : index
    %c0_105 = arith.constant 0 : index
    %219 = vector.load %arg20[%c0_104, %c0_105] : memref<32x128xf32, #tpu.memory_space<vmem>>, vector<32x128xf32>
    tpu.vector_store %arg20[%c0_104, %c0_105], %218 {strides = array<i32>} : memref<32x128xf32, #tpu.memory_space<vmem>>, vector<32x128xf32>,
    return
  }
  func.func @transform_0(%arg0: i32) -> (i32, i32) {
    %c0_i32 = arith.constant 0 : i32
    %c0_i32_0 = arith.constant 0 : i32
    return %arg0, %c0_i32 : i32, i32
  }
  func.func @transform_1(%arg0: i32) -> (i32, i32) {
    %c0_i32 = arith.constant 0 : i32
    %c0_i32_0 = arith.constant 0 : i32
    %c0_i32_1 = arith.constant 0 : i32
    return %c0_i32, %c0_i32_0 : i32, i32
  }
  func.func @transform_2(%arg0: i32) -> (i32, i32) {
    %c0_i32 = arith.constant 0 : i32
    %c0_i32_0 = arith.constant 0 : i32
    %c0_i32_1 = arith.constant 0 : i32
    return %c0_i32, %c0_i32_0 : i32, i32
  }
  func.func @transform_3(%arg0: i32) -> (i32, i32) {
    %c0_i32 = arith.constant 0 : i32
    %c0_i32_0 = arith.constant 0 : i32
    %c0_i32_1 = arith.constant 0 : i32
    return %c0_i32, %c0_i32_0 : i32, i32
  }
  func.func @transform_4(%arg0: i32) -> (i32, i32) {
    %c0_i32 = arith.constant 0 : i32
    %c0_i32_0 = arith.constant 0 : i32
    %c0_i32_1 = arith.constant 0 : i32
    return %c0_i32, %c0_i32_0 : i32, i32
  }
  func.func @transform_5(%arg0: i32) -> (i32, i32, i32) {
    %c0_i32 = arith.constant 0 : i32
    %c0_i32_0 = arith.constant 0 : i32
    %c0_i32_1 = arith.constant 0 : i32
    %c0_i32_2 = arith.constant 0 : i32
    return %c0_i32, %c0_i32_0, %c0_i32_1 : i32, i32, i32
  }
  func.func @transform_6(%arg0: i32) -> (i32, i32) {
    %c0_i32 = arith.constant 0 : i32
    %c0_i32_0 = arith.constant 0 : i32
    %c0_i32_1 = arith.constant 0 : i32
    return %c0_i32, %c0_i32_0 : i32, i32
  }
  func.func @transform_7(%arg0: i32) -> (i32, i32) {
    %c0_i32 = arith.constant 0 : i32
    %c0_i32_0 = arith.constant 0 : i32
    %c0_i32_1 = arith.constant 0 : i32
    return %c0_i32, %c0_i32_0 : i32, i32
  }
  func.func @transform_8(%arg0: i32) -> (i32, i32) {
    %c0_i32 = arith.constant 0 : i32
    %c0_i32_0 = arith.constant 0 : i32
    %c0_i32_1 = arith.constant 0 : i32
    return %c0_i32, %c0_i32_0 : i32, i32
  }
  func.func @transform_9(%arg0: i32) -> (i32, i32, i32) {
    %c0_i32 = arith.constant 0 : i32
    %c0_i32_0 = arith.constant 0 : i32
    %c0_i32_1 = arith.constant 0 : i32
    %c0_i32_2 = arith.constant 0 : i32
    return %c0_i32, %c0_i32_0, %c0_i32_1 : i32, i32, i32
  }
  func.func @transform_10(%arg0: i32) -> (i32, i32) {
    %c0_i32 = arith.constant 0 : i32
    %c0_i32_0 = arith.constant 0 : i32
    %c0_i32_1 = arith.constant 0 : i32
    return %c0_i32, %c0_i32_0 : i32, i32
  }
  func.func @transform_11(%arg0: i32) -> (i32, i32) {
    %c0_i32 = arith.constant 0 : i32
    %c0_i32_0 = arith.constant 0 : i32
    %c0_i32_1 = arith.constant 0 : i32
    return %c0_i32, %c0_i32_0 : i32, i32
  }
  func.func @transform_12(%arg0: i32) -> (i32, i32) {
    %c0_i32 = arith.constant 0 : i32
    %c0_i32_0 = arith.constant 0 : i32
    %c0_i32_1 = arith.constant 0 : i32
    return %c0_i32, %c0_i32_0 : i32, i32
  }
  func.func @transform_13(%arg0: i32) -> (i32, i32, i32) {
    %c0_i32 = arith.constant 0 : i32
    %c0_i32_0 = arith.constant 0 : i32
    %c0_i32_1 = arith.constant 0 : i32
    %c0_i32_2 = arith.constant 0 : i32
    return %c0_i32, %c0_i32_0, %c0_i32_1 : i32, i32, i32
  }
  func.func @transform_14(%arg0: i32) -> (i32, i32) {
    %c0_i32 = arith.constant 0 : i32
    %c0_i32_0 = arith.constant 0 : i32
    %c0_i32_1 = arith.constant 0 : i32
    return %c0_i32, %c0_i32_0 : i32, i32
  }
  func.func @transform_15(%arg0: i32) -> (i32, i32) {
    %c0_i32 = arith.constant 0 : i32
    %c0_i32_0 = arith.constant 0 : i32
    %c0_i32_1 = arith.constant 0 : i32
    return %c0_i32, %c0_i32_0 : i32, i32
  }
  func.func @transform_16(%arg0: i32) -> (i32, i32) {
    %c0_i32 = arith.constant 0 : i32
    %c0_i32_0 = arith.constant 0 : i32
    %c0_i32_1 = arith.constant 0 : i32
    return %c0_i32, %c0_i32_0 : i32, i32
  }
  func.func @transform_17(%arg0: i32) -> (i32, i32) {
    %c0_i32 = arith.constant 0 : i32
    %c0_i32_0 = arith.constant 0 : i32
    %c0_i32_1 = arith.constant 0 : i32
    return %c0_i32, %c0_i32_0 : i32, i32
  }
  func.func @transform_18(%arg0: i32) -> (i32, i32) {
    %c0_i32 = arith.constant 0 : i32
    %c0_i32_0 = arith.constant 0 : i32
    %c0_i32_1 = arith.constant 0 : i32
    return %c0_i32, %c0_i32_0 : i32, i32
  }
  func.func @transform_19(%arg0: i32) -> (i32, i32) {
    %c0_i32 = arith.constant 0 : i32
    %c0_i32_0 = arith.constant 0 : i32
    return %arg0, %c0_i32 : i32, i32
  }
}

</mosaic_0001>

<bundles_post_ra>
// kernel: simple_up_block.1
= control target key start
LH: loop header
LB: loop body
LE: loop exit
PB: predicated region body
PF: predicated region fallthrough
CT: control target
= control target key end

     0   :  { %v103_v0 = vlaneseq  ;;  %v7585_v1 = vmov 0   ;;  %vm148_vm0 = vcmask 1041408   ;;  %vm141_vm1 = vcmask 31744   ;;  %s9083_s1 = inlined_call_operand.vmem [shape: f32[32,1], index: 1, kind: input, shape index: {}]   ;;  %s9084_s5 = inlined_call_operand.vmem [shape: bf16[3,4,64], index: 5, kind: input, shape index: {}]   ;;  %s9085_s0 = inlined_call_operand.vmem [shape: f32[32,4], index: 0, kind: input, shape index: {}]   ;;  %s9086_s2 = inlined_call_operand.vmem [shape: f32[32,1], index: 2, kind: input, shape index: {}]   ;;  %s9087_s3 = inlined_call_operand.vmem [shape: f32[64,64], index: 3, kind: input, shape index: {}]   ;;  %s9088_s6 = inlined_call_operand.vmem [shape: f32[1,64], index: 6, kind: input, shape index: {}]   ;;  %s9089_s9 = inlined_call_operand.vmem [shape: bf16[3,64,64], index: 9, kind: input, shape index: {}]   ;;  %s9090_s7 = inlined_call_operand.vmem [shape: f32[1,64], index: 7, kind: input, shape index: {}]   ;;  %s9091_s8 = inlined_call_operand.vmem [shape: f32[1,64], index: 8, kind: input, shape index: {}]   ;;  %s9092_s10 = inlined_call_operand.vmem [shape: f32[1,64], index: 10, kind: input, shape index: {}]   ;;  %s9093_s13 = inlined_call_operand.vmem [shape: bf16[2,64,128], index: 13, kind: input, shape index: {}]   ;;  %s9094_s4 = inlined_call_operand.vmem [shape: f32[128,128], index: 4, kind: input, shape index: {}]   ;;  %s9095_s11 = inlined_call_operand.vmem [shape: f32[1,64], index: 11, kind: input, shape index: {}]   ;;  %s9096_s12 = inlined_call_operand.vmem [shape: f32[1,64], index: 12, kind: input, shape index: {}]   ;;  %s9097_s14 = inlined_call_operand.vmem [shape: f32[1,128], index: 14, kind: input, shape index: {}]   ;;  %s9098_s17 = inlined_call_operand.vmem [shape: bf16[384,128], index: 17, kind: input, shape index: {}]   ;;  %s9099_s15 = inlined_call_operand.vmem [shape: f32[1,128], index: 15, kind: input, shape index: {}]   ;;  %s9100_s16 = inlined_call_operand.vmem [shape: f32[1,128], index: 16, kind: input, shape index: {}]   ;;  %s9101_s18 = inlined_call_operand.vmem [shape: f32[1,128], index: 18, kind: input, shape index: {}]   ;;  %s9102_s19 = inlined_call_operand.vmem [shape: f32[32,128], index: 19, kind: output, shape index: {}]  }
   0x1   :  { %9141 = sst [smem:[#allocation15_spill]] %s9083_s1  ;;  %7470 = vset.pattern.permute.xlu1 %v7585_v1  ;;  %7469 = vset.pattern.permute.xlu0 %v7585_v1  ;;  %v71_v59 = vld [vmem:[%s9087_s3] sm:$0xff]  ;;  %v72_v60 = vld [vmem:[%s9087_s3 + $0x8] sm:$0xff]  ;;  %v73_v1 = vld [vmem:[%s9087_s3 + $0x10] sm:$0xff]  ;;  %vm7587_vm4 = vmmov 0   ;;  %vm371_vm5 = vcmask 523264  }
   0x2   :  { %9142 = sst [smem:[#allocation16_spill]] %s9084_s5  ;;  %s9145_s20 = sld [smem:[#allocation15_spill]]  ;;  %v7696_v4 = vshrl.u32 %v103_v0, 7  ;;  %v419_v61 = vand.u32 4294901760, %v71_v59  ;;  %v422_v62 = vand.u32 4294901760, %v72_v60  ;;  %v9121_v0 = vmov 0.0|0.0  }
   0x3   :  { %9143 = sst [smem:[#allocation17_spill]] %s9085_s0  ;;  %s9147_s26 = sld [smem:[#allocation16_spill]]  ;;  %6805 = vmatprep.subr.bf16.mxu1 %v9121_v0  ;;  %vm414_vm6 = vcmask 1041409  }
   0x4   :  { %9144 = sst [smem:[#allocation18_spill]] %s9086_s2  ;;  %9146 = vst [vmem:[#allocation2_spill] sm:$0xff] %v7696_v4  ;;  %s9148_s29 = sld [smem:[#allocation17_spill]]  ;;  %vm105_vm2 = vcmp.lt.s32.totalorder %v7696_v4, 1  ;;  %vm263_vm3 = vcmp.lt.s32.totalorder %v7696_v4, 7  ;;  %v7797_v63 = vpack.c.bf16 %v422_v62, %v419_v61 }
   0x5   :  { %s9149_s2 = sld [smem:[#allocation18_spill]] }
   0x6   :  { %6807 = vmatpush3.bf16.msra.mxu1 %v7797_v63 }
   0x7   :  { %6808 = vmatprep.subr.bf16.mxu1 %v9121_v0 }
   0x8   :  { %v65_v2 = vld [vmem:[%s9145_s20 + $0x10] sm:$0xff]  ;;  %v63_v3 = vld [vmem:[%s9145_s20] sm:$0xff]  ;;  %v66_v5 = vld [vmem:[%s9145_s20 + $0x18] sm:$0xff] }
   0x9   :  { %122 = vperm.xlu1 %7470, %v65_v2   ;;  %112 = vperm.xlu0 %7469, %v63_v3   ;;  %v64_v6 = vld [vmem:[%s9145_s20 + $0x8] sm:$0xff]  ;;  %v5238_v7 = vld [vmem:[%s9147_s26 + $0x2] sm:$0x3]  ;;  %v134_v11 = vld [vmem:[%s9147_s26] sm:$0x3]  ;;  %v425_v3 = vand.u32 4294901760, %v73_v1 }
   0xa   :  { %7461 = vmatprep.subr.msk.bf16.mxu0 %vm148_vm0, %v5238_v7  ;;  %v150_v8 = vsel %vm148_vm0, %v5238_v7, 0  ;;  %v95_v9 = vld [vmem:[%s9148_s29] sm:$0xff]  ;;  %v96_v10 = vld [vmem:[%s9148_s29 + $0x8] sm:$0xff]  ;;  %v97_v16 = vld [vmem:[%s9148_s29 + $0x10] sm:$0xff]  ;;  %v208_v20 = vsel %vm148_vm0, %v134_v11, 0 }
   0xb   :  { %5832 = vmatpush3.bf16.msra.mxu0 %v150_v8  ;;  %v99_v12 = vrot.slane %v95_v9, 7  ;;  %v100_v13 = vrot.slane %v96_v10, 7  ;;  %v139_v14 = vpack.c.bf16 %v96_v10, %v95_v9  ;;  %v259_v15 = vrot.slane %v95_v9, 1  ;;  %v98_v17 = vld [vmem:[%s9148_s29 + $0x18] sm:$0xff]  ;;  %v68_v21 = vld [vmem:[%s9149_s2 + $0x8] sm:$0xff]  ;;  %v67_v22 = vld [vmem:[%s9149_s2] sm:$0xff] }
   0xc   :  { %v260_v18 = vrot.slane %v96_v10, 1  ;;  %v140_v19 = vpack.c.bf16 %v98_v17, %v97_v16  ;;  %7462 = vmatprep.subr.msk.bf16.mxu0 %vm148_vm0, %v134_v11  ;;  %v101_v23 = vrot.slane %v97_v16, 7  ;;  %v102_v24 = vrot.slane %v98_v17, 7  ;;  %v5243_v32 = vld [vmem:[%s9147_s26 + $0x4] sm:$0x3]  ;;  %v70_v33 = vld [vmem:[%s9149_s2 + $0x18] sm:$0xff] }
   0xd   :  { %127 = vperm.xlu1 %7470, %v66_v5   ;;  %117 = vperm.xlu0 %7469, %v64_v6   ;;  %v108_v25 = vsel %vm105_vm2, %v99_v12, %v100_v13  ;;  %v261_v26 = vrot.slane %v97_v16, 1  ;;  %v69_v34 = vld [vmem:[%s9149_s2 + $0x10] sm:$0xff]  ;;  %v303_v35 = vsel %vm148_vm0, %v5243_v32, 0  ;;  %v262_v36 = vrot.slane %v98_v17, 1  ;;  %v74_v2 = vld [vmem:[%s9087_s3 + $0x18] sm:$0xff]  ;;  %v75_v7 = vld [vmem:[%s9087_s3 + $0x20] sm:$0xff] }
   0xe   :  { %5833 = vmatprep.mubr.msk.bf16.mxu0 %vm141_vm1, %v139_v14  ;;  %v107_v27 = vsel %vm105_vm2, %v100_v13, %v101_v23  ;;  %v109_v28 = vsel %vm105_vm2, %v102_v24, %v99_v12  ;;  %v106_v29 = vsel %vm105_vm2, %v101_v23, %v102_v24  ;;  %v266_v30 = vsel %vm263_vm3, %v259_v15, %v260_v18  ;;  %v76_v8 = vld [vmem:[%s9087_s3 + $0x28] sm:$0xff]  ;;  %v77_v11 = vld [vmem:[%s9087_s3 + $0x30] sm:$0xff]  ;;  %v78_v12 = vld [vmem:[%s9087_s3 + $0x38] sm:$0xff] }
   0xf   :  { %5834 = vmatmul.mubr.msk.bf16.vlgmr.msra.gmra.mrb[0].mxu0 %vm141_vm1, %v140_v19  ;;  %v265_v31 = vsel %vm263_vm3, %v260_v18, %v261_v26  ;;  %v267_v37 = vsel %vm263_vm3, %v262_v36, %v259_v15  ;;  %v264_v38 = vsel %vm263_vm3, %v261_v26, %v262_v36  ;;  %v428_v5 = vand.u32 4294901760, %v74_v2 }
  0x10   :  { %5838 = vmatpush3.bf16.msra.mxu0 %v208_v20  ;;  %v431_v9 = vand.u32 4294901760, %v75_v7  ;;  %v434_v10 = vand.u32 4294901760, %v76_v8  ;;  %v437_v13 = vand.u32 4294901760, %v77_v11  ;;  %v440_v14 = vand.u32 4294901760, %v78_v12 }
  0x11   :  { %275 = vperm.xlu1 %7470, %v68_v21   ;;  %270 = vperm.xlu0 %7469, %v67_v22   ;;  %v7811_v6 = vpack.c.bf16 %v428_v5, %v425_v3  ;;  %v9123_v16 = vmov 0.0   ;;  %v503_v17 = vsub.f32 %v71_v59, %v419_v61  ;;  %v510_v18 = vsub.f32 %v72_v60, %v422_v62 }
  0x12   :  { %7463 = vmatprep.subr.msk.bf16.mxu0 %vm148_vm0, %v5243_v32  ;;  %v7829_v15 = vpack.c.bf16 %v434_v10, %v431_v9  ;;  %5865 = vmatprep.mubr.msk.f32.mxu1 %vm7587_vm4, %v9123_v16  ;;  %v7837_v19 = vpack.c.bf16 %v440_v14, %v437_v13  ;;  %v517_v24 = vsub.f32 %v73_v1, %v425_v3 }
  0x13   :  { %6810 = vmatpush3.bf16.msra.mxu1 %v7811_v6  ;;  %v504_v20 = vand.u32 4294901760, %v503_v17  ;;  %v511_v21 = vand.u32 4294901760, %v510_v18  ;;  %v7853_v62 = vpack.c.bf16 %v510_v18, %v503_v17 }
  0x14   :  { %6811 = vmatprep.subr.bf16.mxu1 %v9121_v0 }
  0x15   :  { %285 = vperm.xlu1 %7470, %v70_v33   ;;  %280 = vperm.xlu0 %7469, %v69_v34   ;;  %v505_v22 = vsub.f32 %v503_v17, %v504_v20  ;;  %v512_v23 = vsub.f32 %v510_v18, %v511_v21  ;;  %v531_v33 = vsub.f32 %v75_v7, %v431_v9 }
  0x16   :  { %v538_v34 = vsub.f32 %v76_v8, %v434_v10  ;;  %v5246_v10 = vld [vmem:[%s9088_s6] ss:$0 sm:$0xff] }
  0x17   :  { %6813 = vmatpush3.bf16.msra.mxu1 %v7829_v15  ;;  %v506_v26 = vand.u32 4294901760, %v505_v22 }
  0x18   :  { %6814 = vmatprep.subr.bf16.mxu1 %v9121_v0 }
  0x1b   :  { %6816 = vmatpush3.bf16.msra.mxu1 %v7837_v19 }
  0x1c   :  { %6817 = vmatprep.subr.bf16.mxu1 %v9121_v0 }
  0x88   :  { %v7763_v39 = vpop.permute.xlu1 %122  ;;  %v7765_v40 = vpop.permute.xlu0 %112 }
  0x89   :  { %9150 = vst [vmem:[#allocation3_spill] sm:$0xff] %v7763_v39  ;;  %9151 = vst [vmem:[#allocation4_spill] sm:$0xff] %v7765_v40  ;;  %v132_v43 = vmul.f32 %v7763_v39, %v107_v27  ;;  %v130_v44 = vmul.f32 %v7765_v40, %v109_v28  ;;  %v513_v27 = vand.u32 4294901760, %v512_v23  ;;  %v518_v28 = vand.u32 4294901760, %v517_v24 }
  0x8c   :  { %v7767_v41 = vpop.permute.xlu1 %127  ;;  %v7769_v42 = vpop.permute.xlu0 %117 }
  0x8d   :  { %9152 = vst [vmem:[#allocation5_spill] sm:$0xff] %v7767_v41  ;;  %9153 = vst [vmem:[#allocation6_spill] sm:$0xff] %v7769_v42  ;;  %v133_v45 = vmul.f32 %v7767_v41, %v106_v29  ;;  %v131_v46 = vmul.f32 %v7769_v42, %v108_v25  ;;  %v524_v25 = vsub.f32 %v74_v2, %v428_v5 }
  0x8e   :  { %v7857_v2 = vpack.c.bf16 %v538_v34, %v531_v33  ;;  %v7861_v5 = vpack.c.bf16 %v511_v21, %v504_v20 }
  0x8f   :  { %v136_v47 = vpack.c.bf16 %v133_v45, %v132_v43  ;;  %v135_v48 = vpack.c.bf16 %v131_v46, %v130_v44  ;;  %v525_v29 = vand.u32 4294901760, %v524_v25  ;;  %v545_v46 = vsub.f32 %v77_v11, %v437_v13 }
  0x90   :  { %v7775_v49 = vpop.permute.xlu1 %275  ;;  %v7777_v50 = vpop.permute.xlu0 %270  ;;  %v7855_v1 = vpack.c.bf16 %v524_v25, %v517_v24 }
  0x91   :  { %9154 = vst [vmem:[#allocation7_spill] sm:$0xff] %v7775_v49  ;;  %9155 = vst [vmem:[#allocation8_spill] sm:$0xff] %v7777_v50  ;;  %v289_v51 = vmul.f32 %v7775_v49, %v265_v31  ;;  %v288_v52 = vmul.f32 %v7777_v50, %v266_v30  ;;  %5839 = vmatprep.mubr.msk.bf16.mxu0 %vm141_vm1, %v135_v48  ;;  %v7845_v30 = vpack.c.bf16 %v513_v27, %v506_v26 }
  0x92   :  { %5840 = vmatmul.mubr.msk.bf16.vlgmr.msra.gmra.mrb[0].mxu0 %vm141_vm1, %v136_v47  ;;  %v519_v31 = vsub.f32 %v517_v24, %v518_v28  ;;  %v526_v32 = vsub.f32 %v524_v25, %v525_v29  ;;  %v552_v47 = vsub.f32 %v78_v12, %v440_v14  ;;  %v7863_v7 = vpack.c.bf16 %v525_v29, %v518_v28 }
  0x93   :  { %5844 = vmatpush3.bf16.msra.mxu0 %v303_v35  ;;  %v294_v53 = vpack.c.bf16 %v289_v51, %v288_v52  ;;  %v546_v52 = vand.u32 4294901760, %v545_v46 }
  0x94   :  { %v7783_v54 = vpop.permute.xlu1 %285  ;;  %v7785_v55 = vpop.permute.xlu0 %280  ;;  %6877 = vmatprep.subr.bf16.mxu0 %v9121_v0  ;;  %v520_v35 = vand.u32 4294901760, %v519_v31  ;;  %v527_v36 = vand.u32 4294901760, %v526_v32  ;;  %v7859_v3 = vpack.c.bf16 %v552_v47, %v545_v46 }
  0x95   :  { %9156 = vst [vmem:[#allocation9_spill] sm:$0xff] %v7783_v54  ;;  %9157 = vst [vmem:[#allocation10_spill] sm:$0xff] %v7785_v55  ;;  %v291_v56 = vmul.f32 %v7783_v54, %v267_v37  ;;  %v290_v57 = vmul.f32 %v7785_v55, %v264_v38  ;;  %5845 = vmatprep.mubr.msk.bf16.mxu0 %vm141_vm1, %v294_v53  ;;  %v532_v37 = vand.u32 4294901760, %v531_v33  ;;  %v539_v38 = vand.u32 4294901760, %v538_v34 }
  0x96   :  { %v7847_v43 = vpack.c.bf16 %v527_v36, %v520_v35  ;;  %v553_v53 = vand.u32 4294901760, %v552_v47 }
  0x97   :  { %v295_v58 = vpack.c.bf16 %v291_v56, %v290_v57  ;;  %v533_v44 = vsub.f32 %v531_v33, %v532_v37  ;;  %v540_v45 = vsub.f32 %v538_v34, %v539_v38  ;;  %v547_v57 = vsub.f32 %v545_v46, %v546_v52 }
  0x98   :  { %v7865_v8 = vpack.c.bf16 %v539_v38, %v532_v37  ;;  %v7867_v9 = vpack.c.bf16 %v553_v53, %v546_v52 }
  0x99   :  { %v534_v48 = vand.u32 4294901760, %v533_v44  ;;  %v541_v51 = vand.u32 4294901760, %v540_v45  ;;  %v548_v59 = vand.u32 4294901760, %v547_v57 }
  0x9b   :  { %v7849_v56 = vpack.c.bf16 %v541_v51, %v534_v48 }
  0x9e   :  { %5846 = vmatmul.mubr.msk.bf16.vlgmr.msra.gmra.mrb[0].mxu0 %vm141_vm1, %v295_v58  ;;  %v554_v58 = vsub.f32 %v552_v47, %v553_v53 }
  0x9f   :  { %6879 = vmatpush3.bf16.msra.mxu0 %v7797_v63  ;;  %5979 = vmatprep.mubr.msk.f32.mxu0 %vm7587_vm4, %v9123_v16 }
  0xa0   :  { %6880 = vmatprep.subr.bf16.mxu0 %v9121_v0  ;;  %v555_v60 = vand.u32 4294901760, %v554_v58 }
  0xa2   :  { %v7851_v61 = vpack.c.bf16 %v555_v60, %v548_v59 }
  0xa3   :  { %6882 = vmatpush3.bf16.msra.mxu0 %v7811_v6 }
  0xa4   :  { %6883 = vmatprep.subr.bf16.mxu0 %v9121_v0 }
  0xa7   :  { %6885 = vmatpush3.bf16.msra.mxu0 %v7829_v15 }
  0xa8   :  { %6886 = vmatprep.subr.bf16.mxu0 %v9121_v0 }
  0xab   :  { %6888 = vmatpush3.bf16.msra.mxu0 %v7837_v19 }
  0xac   :  { %6889 = vmatprep.subr.bf16.mxu0 %v9121_v0 }
 0x171   :  { %v5847_v11 = vpop.f32.mrb[0].mxu0 }
 0x172   :  { %v7872_v12 = vadd.f32 %v5847_v11, %v5246_v10  ;;  %v339_v13 = vpop.f32.mrb[1].mxu0 }
 0x173   :  { %v7874_v14 = vadd.f32 %v5246_v10, %v339_v13  ;;  %v5848_v17 = vpop.f32.mrb[2].mxu0 }
 0x174   :  { %v392_v18 = vmul.f32 %v7872_v12, %v7872_v12  ;;  %v7878_v20 = vadd.f32 %v5848_v17, %v5246_v10  ;;  %v342_v21 = vpop.f32.mrb[3].mxu0  ;;  %v381_v24 = vsel %vm371_vm5, %v7872_v12, 0.0 }
 0x175   :  { %v390_v22 = vmul.f32 %v7874_v14, %v7874_v14  ;;  %v7882_v23 = vadd.f32 %v5246_v10, %v342_v21  ;;  %v372_v27 = vsel %vm371_vm5, %v7874_v14, 0.0 }
 0x176   :  { %v382_v25 = vsel %vm371_vm5, %v7878_v20, 0.0  ;;  %v393_v26 = vmul.f32 %v7878_v20, %v7878_v20  ;;  %v403_v32 = vsel %vm371_vm5, %v392_v18, 0.0 }
 0x177   :  { %v383_v28 = vadd.f32 %v382_v25, %v381_v24  ;;  %v373_v29 = vsel %vm371_vm5, %v7882_v23, 0.0  ;;  %v391_v31 = vmul.f32 %v7882_v23, %v7882_v23  ;;  %v394_v35 = vsel %vm371_vm5, %v390_v22, 0.0 }
 0x178   :  { %v404_v33 = vsel %vm371_vm5, %v393_v26, 0.0  ;;  %v374_v34 = vadd.f32 %v373_v29, %v372_v27 }
 0x179   :  { %v384_v36 = vrot.slane %v383_v28, 4  ;;  %v405_v37 = vadd.f32 %v404_v33, %v403_v32  ;;  %v395_v38 = vsel %vm371_vm5, %v391_v31, 0.0 }
 0x17a   :  { %v375_v44 = vrot.slane %v374_v34, 4  ;;  %v396_v45 = vadd.f32 %v395_v38, %v394_v35 }
 0x17b   :  { %v385_v46 = vadd.f32 %v384_v36, %v383_v28  ;;  %v406_v47 = vrot.slane %v405_v37, 4 }
 0x17c   :  { %v376_v48 = vadd.f32 %v375_v44, %v374_v34  ;;  %v397_v51 = vrot.slane %v396_v45, 4 }
 0x17d   :  { %v386_v52 = vrot.slane %v385_v46, 2  ;;  %v407_v53 = vadd.f32 %v406_v47, %v405_v37 }
 0x17e   :  { %v377_v57 = vrot.slane %v376_v48, 2  ;;  %v398_v58 = vadd.f32 %v397_v51, %v396_v45  ;;  %v7471_v51 = vld [vmem:[%s9089_s9 + $0x20] sm:$0xff]  }
 0x17f   :  { %v387_v59 = vadd.f32 %v386_v52, %v385_v46  ;;  %v408_v60 = vrot.slane %v407_v53, 2  ;;  %v7472_v52 = vld [vmem:[%s9089_s9 + $0x28] sm:$0xff]  }
 0x180   :  { %v378_v10 = vadd.f32 %v377_v57, %v376_v48  ;;  %v399_v11 = vrot.slane %v398_v58, 2  ;;  %v7474_v57 = vld [vmem:[%s9089_s9 + $0x38] sm:$0xff]  }
 0x181   :  { %v388_v13 = vrot.slane %v387_v59, 1  ;;  %v409_v17 = vadd.f32 %v408_v60, %v407_v53  ;;  %v7473_v53 = vld [vmem:[%s9089_s9 + $0x30] sm:$0xff]  }
 0x182   :  { %v379_v18 = vrot.slane %v378_v10, 1  ;;  %v400_v21 = vadd.f32 %v399_v11, %v398_v58  ;;  %v8058_v58 = vld [vmem:[%s9089_s9] sm:$0xff]  }
 0x183   :  { %v389_v22 = vadd.f32 %v388_v13, %v387_v59  ;;  %v410_v24 = vrot.slane %v409_v17, 1 }
 0x184   :  { %v380_v25 = vadd.f32 %v379_v18, %v378_v10  ;;  %v401_v26 = vrot.slane %v400_v21, 1 }
 0x185   :  { %v411_v27 = vadd.f32 %v410_v24, %v409_v17 }
 0x186   :  { %v402_v28 = vadd.f32 %v401_v26, %v400_v21  ;;  %v415_v29 = vsel %vm414_vm6, %v389_v22, %v380_v25  ;;  %v7589_v22 = vmov 1966171168   ;;  %v5247_v26 = vld [vmem:[%s9090_s7] ss:$0 sm:$0xff] }
 0x187   :  { %v416_v31 = vsel %vm371_vm5, %v415_v29, 0  ;;  %v1519_v24 = vunpack.c.l.s4 %v7589_v22 }
 0x188   :  { %v7902_v32 = vand.u32 4294901760, %v416_v31  ;;  %v957_v33 = vsel %vm414_vm6, %v411_v27, %v402_v28 }
 0x189   :  { %v958_v34 = vsel %vm371_vm5, %v957_v33, 0  ;;  %v1520_v25 = vunpack.c.0.s8 %v1519_v24 }
 0x18a   :  { %v7907_v35 = vsub.f32 %v416_v31, %v7902_v32  ;;  %v7909_v36 = vand.u32 4294901760, %v958_v34  ;;  %v5248_v31 = vld [vmem:[%s9091_s8] ss:$0 sm:$0xff] }
 0x18b   :  { %v8065_v27 = vsub.s32 %v1520_v25, %v7696_v4 }
 0x18c   :  { %v493_v37 = vand.u32 4294901760, %v7907_v35  ;;  %v7913_v38 = vsub.f32 %v958_v34, %v7909_v36 }
 0x18e   :  { %v494_v44 = vsub.f32 %v7907_v35, %v493_v37  ;;  %v1035_v45 = vand.u32 4294901760, %v7913_v38 }
 0x190   :  { %v495_v46 = vand.u32 4294901760, %v494_v44  ;;  %v1036_v47 = vsub.f32 %v7913_v38, %v1035_v45 }
 0x192   :  { %5866 = vmatmul.mubr.f32.vlgmr.msra.gmra.mrb[0].mxu1 %v495_v46  ;;  %v1037_v48 = vand.u32 4294901760, %v1036_v47 }
 0x193   :  { %6819 = vmatpush3.bf16.msra.mxu1 %v7845_v30  ;;  %5884 = vmatprep.mubr.msk.f32.mxu1 %vm7587_vm4, %v9123_v16 }
 0x194   :  { %5980 = vmatmul.mubr.f32.vlgmr.msra.gmra.mrb[4].mxu0 %v1037_v48  ;;  %6820 = vmatprep.subr.bf16.mxu1 %v9121_v0 }
 0x195   :  { %6891 = vmatpush3.bf16.msra.mxu0 %v7845_v30  ;;  %5998 = vmatprep.mubr.msk.f32.mxu0 %vm7587_vm4, %v9123_v16 }
 0x196   :  { %6892 = vmatprep.subr.bf16.mxu0 %v9121_v0 }
 0x197   :  { %6822 = vmatpush3.bf16.msra.mxu1 %v7847_v43 }
 0x198   :  { %6823 = vmatprep.subr.bf16.mxu1 %v9121_v0 }
 0x199   :  { %6894 = vmatpush3.bf16.msra.mxu0 %v7847_v43 }
 0x19a   :  { %6895 = vmatprep.subr.bf16.mxu0 %v9121_v0 }
 0x19b   :  { %6825 = vmatpush3.bf16.msra.mxu1 %v7849_v56 }
 0x19c   :  { %6826 = vmatprep.subr.bf16.mxu1 %v9121_v0 }
 0x19d   :  { %6897 = vmatpush3.bf16.msra.mxu0 %v7849_v56 }
 0x19e   :  { %6898 = vmatprep.subr.bf16.mxu0 %v9121_v0 }
 0x19f   :  { %6828 = vmatpush3.bf16.msra.mxu1 %v7851_v61 }
 0x1a0   :  { %6829 = vmatprep.subr.bf16.mxu1 %v9121_v0 }
 0x1a1   :  { %6900 = vmatpush3.bf16.msra.mxu0 %v7851_v61 }
 0x1a2   :  { %5885 = vmatmul.mubr.f32.vlgmr.msra.gmra.mrb[0].mxu1 %v7902_v32  ;;  %6901 = vmatprep.subr.bf16.mxu0 %v9121_v0 }
 0x1a3   :  { %6831 = vmatpush3.bf16.msra.mxu1 %v7853_v62  ;;  %5903 = vmatprep.mubr.msk.f32.mxu1 %vm7587_vm4, %v9123_v16 }
 0x1a4   :  { %5999 = vmatmul.mubr.f32.vlgmr.msra.gmra.mrb[4].mxu0 %v7909_v36  ;;  %6832 = vmatprep.subr.bf16.mxu1 %v9121_v0 }
 0x1a5   :  { %6903 = vmatpush3.bf16.msra.mxu0 %v7853_v62  ;;  %6017 = vmatprep.mubr.msk.f32.mxu0 %vm7587_vm4, %v9123_v16 }
 0x1a6   :  { %6904 = vmatprep.subr.bf16.mxu0 %v9121_v0 }
 0x1a7   :  { %6834 = vmatpush3.bf16.msra.mxu1 %v7855_v1 }
 0x1a8   :  { %6835 = vmatprep.subr.bf16.mxu1 %v9121_v0 }
 0x1a9   :  { %6906 = vmatpush3.bf16.msra.mxu0 %v7855_v1 }
 0x1aa   :  { %6907 = vmatprep.subr.bf16.mxu0 %v9121_v0 }
 0x1ab   :  { %6837 = vmatpush3.bf16.msra.mxu1 %v7857_v2 }
 0x1ac   :  { %6838 = vmatprep.subr.bf16.mxu1 %v9121_v0 }
 0x1ad   :  { %6909 = vmatpush3.bf16.msra.mxu0 %v7857_v2 }
 0x1ae   :  { %6910 = vmatprep.subr.bf16.mxu0 %v9121_v0 }
 0x1af   :  { %6840 = vmatpush3.bf16.msra.mxu1 %v7859_v3 }
 0x1b0   :  { %6841 = vmatprep.subr.bf16.mxu1 %v9121_v0 }
 0x1b1   :  { %6912 = vmatpush3.bf16.msra.mxu0 %v7859_v3 }
 0x1b2   :  { %5904 = vmatmul.mubr.f32.vlgmr.msra.gmra.mrb[0].mxu1 %v7907_v35  ;;  %6913 = vmatprep.subr.bf16.mxu0 %v9121_v0 }
 0x1b3   :  { %6843 = vmatpush3.bf16.msra.mxu1 %v7797_v63  ;;  %5922 = vmatprep.mubr.msk.f32.mxu1 %vm7587_vm4, %v9123_v16 }
 0x1b4   :  { %6018 = vmatmul.mubr.f32.vlgmr.msra.gmra.mrb[4].mxu0 %v7913_v38  ;;  %6844 = vmatprep.subr.bf16.mxu1 %v9121_v0 }
 0x1b5   :  { %6915 = vmatpush3.bf16.msra.mxu0 %v7797_v63  ;;  %6036 = vmatprep.mubr.msk.f32.mxu0 %vm7587_vm4, %v9123_v16 }
 0x1b6   :  { %6916 = vmatprep.subr.bf16.mxu0 %v9121_v0 }
 0x1b7   :  { %6846 = vmatpush3.bf16.msra.mxu1 %v7811_v6 }
 0x1b8   :  { %6847 = vmatprep.subr.bf16.mxu1 %v9121_v0 }
 0x1b9   :  { %6918 = vmatpush3.bf16.msra.mxu0 %v7811_v6 }
 0x1ba   :  { %6919 = vmatprep.subr.bf16.mxu0 %v9121_v0 }
 0x1bb   :  { %6849 = vmatpush3.bf16.msra.mxu1 %v7829_v15 }
 0x1bc   :  { %6850 = vmatprep.subr.bf16.mxu1 %v9121_v0 }
 0x1bd   :  { %6921 = vmatpush3.bf16.msra.mxu0 %v7829_v15 }
 0x1be   :  { %6922 = vmatprep.subr.bf16.mxu0 %v9121_v0 }
 0x1bf   :  { %6852 = vmatpush3.bf16.msra.mxu1 %v7837_v19 }
 0x1c0   :  { %6853 = vmatprep.subr.bf16.mxu1 %v9121_v0 }
 0x1c1   :  { %6924 = vmatpush3.bf16.msra.mxu0 %v7837_v19 }
 0x1c2   :  { %5923 = vmatmul.mubr.f32.vlgmr.msra.gmra.mrb[0].mxu1 %v493_v37  ;;  %6925 = vmatprep.subr.bf16.mxu0 %v9121_v0 }
 0x1c3   :  { %6855 = vmatpush3.bf16.msra.mxu1 %v7861_v5  ;;  %5941 = vmatprep.mubr.msk.f32.mxu1 %vm7587_vm4, %v9123_v16 }
 0x1c4   :  { %6037 = vmatmul.mubr.f32.vlgmr.msra.gmra.mrb[4].mxu0 %v1035_v45  ;;  %6856 = vmatprep.subr.bf16.mxu1 %v9121_v0 }
 0x1c5   :  { %6927 = vmatpush3.bf16.msra.mxu0 %v7861_v5  ;;  %6055 = vmatprep.mubr.msk.f32.mxu0 %vm7587_vm4, %v9123_v16 }
 0x1c6   :  { %6928 = vmatprep.subr.bf16.mxu0 %v9121_v0 }
 0x1c7   :  { %6858 = vmatpush3.bf16.msra.mxu1 %v7863_v7 }
 0x1c8   :  { %6859 = vmatprep.subr.bf16.mxu1 %v9121_v0 }
 0x1c9   :  { %6930 = vmatpush3.bf16.msra.mxu0 %v7863_v7 }
 0x1ca   :  { %6931 = vmatprep.subr.bf16.mxu0 %v9121_v0 }
 0x1cb   :  { %6861 = vmatpush3.bf16.msra.mxu1 %v7865_v8 }
 0x1cc   :  { %6862 = vmatprep.subr.bf16.mxu1 %v9121_v0 }
 0x1cd   :  { %6933 = vmatpush3.bf16.msra.mxu0 %v7865_v8 }
 0x1ce   :  { %6934 = vmatprep.subr.bf16.mxu0 %v9121_v0 }
 0x1cf   :  { %6864 = vmatpush3.bf16.msra.mxu1 %v7867_v9 }
 0x1d0   :  { %6865 = vmatprep.subr.bf16.mxu1 %v9121_v0 }
 0x1d1   :  { %6936 = vmatpush3.bf16.msra.mxu0 %v7867_v9 }
 0x1d2   :  { %5942 = vmatmul.mubr.f32.vlgmr.msra.gmra.mrb[0].mxu1 %v7902_v32  ;;  %6937 = vmatprep.subr.bf16.mxu0 %v9121_v0 }
 0x1d3   :  { %6867 = vmatpush3.bf16.msra.mxu1 %v7797_v63  ;;  %5960 = vmatprep.mubr.msk.f32.mxu1 %vm7587_vm4, %v9123_v16 }
 0x1d4   :  { %6056 = vmatmul.mubr.f32.vlgmr.msra.gmra.mrb[4].mxu0 %v7909_v36  ;;  %6868 = vmatprep.subr.bf16.mxu1 %v9121_v0 }
 0x1d5   :  { %6939 = vmatpush3.bf16.msra.mxu0 %v7797_v63  ;;  %6074 = vmatprep.mubr.msk.f32.mxu0 %vm7587_vm4, %v9123_v16 }
 0x1d6   :  { %6940 = vmatprep.subr.bf16.mxu0 %v9121_v0 }
 0x1d7   :  { %6870 = vmatpush3.bf16.msra.mxu1 %v7811_v6 }
 0x1d8   :  { %6871 = vmatprep.subr.bf16.mxu1 %v9121_v0 }
 0x1d9   :  { %6942 = vmatpush3.bf16.msra.mxu0 %v7811_v6 }
 0x1da   :  { %6943 = vmatprep.subr.bf16.mxu0 %v9121_v0 }
 0x1db   :  { %6873 = vmatpush3.bf16.msra.mxu1 %v7829_v15 }
 0x1dc   :  { %6874 = vmatprep.subr.bf16.mxu1 %v9121_v0 }
 0x1dd   :  { %6945 = vmatpush3.bf16.msra.mxu0 %v7829_v15 }
 0x1de   :  { %6946 = vmatprep.subr.bf16.mxu0 %v9121_v0 }
 0x1df   :  { %6876 = vmatpush3.bf16.msra.mxu1 %v7837_v19 }
 0x1e0   :  { %6077 = vmatprep.subr.bf16.mxu1 %v7471_v51 }
 0x1e1   :  { %6948 = vmatpush3.bf16.msra.mxu0 %v7837_v19 }
 0x1e2   :  { %5961 = vmatmul.mubr.f32.vlgmr.msra.gmra.mrb[0].mxu1 %v7902_v32  ;;  %6949 = vmatprep.subr.bf16.mxu0 %v9121_v0  ;;  %v8071_v32 = vsub.s32 0, %v7696_v4 }
 0x1e3   :  { %6078 = vmatpush3.bf16.msra.mxu1 %v7471_v51 }
 0x1e4   :  { %6075 = vmatmul.mubr.f32.vlgmr.msra.gmra.mrb[4].mxu0 %v7909_v36  ;;  %6079 = vmatprep.subr.bf16.mxu1 %v7472_v52 }
 0x1e5   :  { %6951 = vmatpush3.bf16.msra.mxu0 %v7797_v63  ;;  %6129 = vmatprep.mubr.msk.f32.mxu0 %vm7587_vm4, %v9123_v16 }
 0x1e6   :  { %6952 = vmatprep.subr.bf16.mxu0 %v9121_v0 }
 0x1e7   :  { %6080 = vmatpush3.bf16.msra.mxu1 %v7472_v52 }
 0x1e8   :  { %6081 = vmatprep.subr.bf16.mxu1 %v7473_v53 }
 0x1e9   :  { %6954 = vmatpush3.bf16.msra.mxu0 %v7811_v6 }
 0x1ea   :  { %6955 = vmatprep.subr.bf16.mxu0 %v9121_v0 }
 0x1eb   :  { %6082 = vmatpush3.bf16.msra.mxu1 %v7473_v53 }
 0x1ec   :  { %6083 = vmatprep.subr.bf16.mxu1 %v7474_v57 }
 0x1ed   :  { %6957 = vmatpush3.bf16.msra.mxu0 %v7829_v15 }
 0x1ee   :  { %6958 = vmatprep.subr.bf16.mxu0 %v9121_v0 }
 0x1ef   :  { %6084 = vmatpush3.bf16.msra.mxu1 %v7474_v57 }
 0x1f0   :  { %6089 = vmatprep.subr.bf16.mxu1 %v8058_v58 }
 0x1f1   :  { %6960 = vmatpush3.bf16.msra.mxu0 %v7837_v19 }
 0x1f2   :  { %6961 = vmatprep.subr.bf16.mxu0 %v9121_v0 }
 0x2b5   :  { %v951_v59 = vpop.f32.mrb[0].mxu1 }
 0x2b6   :  { %v1497_v60 = vmul.f32 %v951_v59, %v951_v59  ;;  %v5962_v10 = vpop.f32.mrb[1].mxu1 }
 0x2b7   :  { %v1493_v11 = vpop.f32.mrb[4].mxu0 }
 0x2b8   :  { %v1498_v13 = vsub.f32 %v1493_v11, %v1497_v60  ;;  %v6076_v17 = vpop.f32.mrb[5].mxu0 }
 0x2ba   :  { %v1499_v18 = vmax.f32 %v1498_v13, 0.0 }
 0x2bc   :  { %v1500_v21 = vadd.f32 1e-05, %v1499_v18 }
 0x2be   :  { %7515 = vrsqrt.f32 %v1500_v21 }
 0x2c8   :  { %v7516_v28 = vpop.eup %7515 }
 0x2c9   :  { %v1508_v29 = vmul.f32 %v7516_v28, %v5247_v26 }
 0x2cb   :  { %v1509_v33 = vmul.f32 %v1508_v29, %v951_v59  ;;  %v1524_v34 = vrot.slane %v1508_v29, %v8065_v27 }
 0x2cd   :  { %v1516_v35 = vsub.f32 %v5248_v31, %v1509_v33  ;;  %v1525_v36 = vcombine.high %v1524_v34, %v1524_v34  ;;  %v1532_v37 = vrot.slane %v1524_v34, %v8065_v27 }
 0x2cf   :  { %v1539_v38 = vrot.slane %v1525_v36, %v8065_v27  ;;  %v1543_v44 = vrot.slane %v1532_v37, %v8071_v32  ;;  %v1561_v45 = vrot.slane %v1516_v35, %v8065_v27 }
 0x2d1   :  { %v1547_v46 = vrot.slane %v1539_v38, %v8071_v32  ;;  %v1562_v47 = vcombine.high %v1561_v45, %v1561_v45  ;;  %v1569_v48 = vrot.slane %v1561_v45, %v8065_v27  ;;  %v1550_v52 = vmul.f32 %v1543_v44, %v7874_v14 }
 0x2d2   :  { %v1551_v53 = vmul.f32 %v1543_v44, %v7882_v23 }
 0x2d3   :  { %v1576_v51 = vrot.slane %v1562_v47, %v8065_v27  ;;  %v1580_v57 = vrot.slane %v1569_v48, %v8071_v32  ;;  %v1552_v59 = vmul.f32 %v1547_v46, %v7872_v12  ;;  %v1553_v60 = vmul.f32 %v1547_v46, %v7878_v20 }
 0x2d5   :  { %v1587_v10 = vadd.f32 %v1580_v57, %v1550_v52  ;;  %v1588_v11 = vadd.f32 %v1580_v57, %v1551_v53  ;;  %v1584_v13 = vrot.slane %v1576_v51, %v8071_v32 }
 0x2d7   :  { %v1591_v17 = vmin.f32 %v1587_v10, 30.0  ;;  %v1592_v18 = vmin.f32 %v1588_v11, 30.0  ;;  %v1589_v21 = vadd.f32 %v1584_v13, %v1552_v59  ;;  %v1590_v22 = vadd.f32 %v1584_v13, %v1553_v60 }
 0x2d9   :  { %v1595_v24 = vmul.f32 1.442695, %v1591_v17  ;;  %v1597_v25 = vmul.f32 1.442695, %v1592_v18  ;;  %v1593_v26 = vmin.f32 %v1589_v21, 30.0  ;;  %v1594_v14 = vmin.f32 %v1590_v22, 30.0 }
 0x2db   :  { %7517 = vpow2.f32 %v1595_v24  ;;  %v1599_v23 = vmul.f32 1.442695, %v1593_v26  ;;  %v1601_v28 = vmul.f32 1.442695, %v1594_v14 }
 0x2dc   :  { %7519 = vpow2.f32 %v1597_v25 }
 0x2dd   :  { %7521 = vpow2.f32 %v1599_v23 }
 0x2de   :  { %7523 = vpow2.f32 %v1601_v28 }
 0x2e5   :  { %v7518_v12 = vpop.eup %7517 }
 0x2e6   :  { %v7520_v20 = vpop.eup %7519  ;;  %v1603_v29 = vadd.f32 2.0, %v7518_v12 }
 0x2e7   :  { %v7522_v31 = vpop.eup %7521  ;;  %v1604_v33 = vadd.f32 2.0, %v7520_v20 }
 0x2e8   :  { %v7524_v34 = vpop.eup %7523  ;;  %v1607_v35 = vmul.f32 %v7518_v12, %v1603_v29  ;;  %v1605_v36 = vadd.f32 2.0, %v7522_v31 }
 0x2e9   :  { %v1608_v37 = vmul.f32 %v7520_v20, %v1604_v33  ;;  %v1606_v38 = vadd.f32 2.0, %v7524_v34 }
 0x2ea   :  { %v1611_v44 = vadd.f32 2.0, %v1607_v35  ;;  %v1609_v45 = vmul.f32 %v7522_v31, %v1605_v36 }
 0x2eb   :  { %v1612_v46 = vadd.f32 2.0, %v1608_v37  ;;  %v1610_v47 = vmul.f32 %v7524_v34, %v1606_v38  ;;  %v7477_v37 = vld [vmem:[%s9089_s9 + $0x10] sm:$0xff]  }
 0x2ec   :  { %7525 = vrcp.f32 %v1611_v44  ;;  %v1613_v48 = vadd.f32 2.0, %v1609_v45 }
 0x2ed   :  { %7527 = vrcp.f32 %v1612_v46  ;;  %v1614_v51 = vadd.f32 2.0, %v1610_v47 }
 0x2ee   :  { %7529 = vrcp.f32 %v1613_v48 }
 0x2ef   :  { %7531 = vrcp.f32 %v1614_v51 }
 0x2f6   :  { %v7526_v52 = vpop.eup %7525 }
 0x2f7   :  { %v7528_v53 = vpop.eup %7527  ;;  %v1619_v57 = vmul.f32 2.0, %v7526_v52 }
 0x2f8   :  { %v7530_v59 = vpop.eup %7529  ;;  %v1620_v60 = vmul.f32 2.0, %v7528_v53 }
 0x2f9   :  { %v7532_v13 = vpop.eup %7531  ;;  %v1623_v17 = vsub.f32 1.0, %v1619_v57  ;;  %v1621_v18 = vmul.f32 2.0, %v7530_v59  ;;  %v7479_v59 = vld [vmem:[%s9089_s9 + $0x40] sm:$0xff]  }
 0x2fa   :  { %v1624_v24 = vsub.f32 1.0, %v1620_v60  ;;  %v1622_v25 = vmul.f32 2.0, %v7532_v13 }
 0x2fb   :  { %v8087_v26 = vmul.f32 %v1623_v17, %v1587_v10  ;;  %v1625_v14 = vsub.f32 1.0, %v1621_v18 }
 0x2fc   :  { %v8089_v23 = vmul.f32 %v1624_v24, %v1588_v11  ;;  %v1626_v28 = vsub.f32 1.0, %v1622_v25  ;;  %v7476_v11 = vld [vmem:[%s9089_s9 + $0x8] sm:$0xff]  }
 0x2fd   :  { %v8091_v12 = vmul.f32 %v1625_v14, %v1589_v21  ;;  %v1631_v20 = vrot.slane %v8087_v26, 7  ;;  %v1822_v46 = vrot.slane %v8087_v26, 1  ;;  %v7480_v24 = vld [vmem:[%s9089_s9 + $0x48] sm:$0xff]   ;;  %v7481_v14 = vld [vmem:[%s9089_s9 + $0x50] sm:$0xff]  }
 0x2fe   :  { %v1662_v29 = vpack.c.bf16 %v8089_v23, %v8087_v26  ;;  %v8096_v31 = vmul.f32 %v1626_v28, %v1590_v22  ;;  %v1632_v33 = vrot.slane %v8089_v23, 7  ;;  %v1823_v47 = vrot.slane %v8089_v23, 1 }
 0x2ff   :  { %v1633_v44 = vrot.slane %v8091_v12, 7  ;;  %v1824_v45 = vrot.slane %v8091_v12, 1 }
 0x300   :  { %6085 = vmatprep.mubr.msk.bf16.mxu1 %vm371_vm5, %v1662_v29  ;;  %v1663_v10 = vpack.c.bf16 %v8096_v31, %v8091_v12  ;;  %v1634_v21 = vrot.slane %v8096_v31, 7  ;;  %v1637_v34 = vsel %vm105_vm2, %v1631_v20, %v1632_v33  ;;  %v1828_v60 = vsel %vm263_vm3, %v1822_v46, %v1823_v47 }
 0x301   :  { %v1640_v36 = vmul.f32 %v1637_v34, %v7769_v42  ;;  %v1636_v51 = vsel %vm105_vm2, %v1632_v33, %v1633_v44  ;;  %v1827_v52 = vsel %vm263_vm3, %v1823_v47, %v1824_v45  ;;  %v1830_v17 = vmul.f32 %v1828_v60, %v7777_v50  ;;  %v5283_v34 = vld [vmem:[%s9092_s10] ss:$0 sm:$0xff] }
 0x302   :  { %6086 = vmatmul.mubr.msk.bf16.vlgmr.msra.gmra.mrb[4].mxu1 %vm371_vm5, %v1663_v10  ;;  %v1638_v22 = vsel %vm105_vm2, %v1634_v21, %v1631_v20  ;;  %v1635_v48 = vsel %vm105_vm2, %v1633_v44, %v1634_v21  ;;  %v1641_v53 = vmul.f32 %v1636_v51, %v7763_v39  ;;  %v1831_v13 = vmul.f32 %v1827_v52, %v7775_v49  ;;  %v7482_v20 = vld [vmem:[%s9089_s9 + $0x58] sm:$0xff]  }
 0x303   :  { %6090 = vmatpush3.bf16.msra.mxu1 %v8058_v58  ;;  %v1639_v35 = vmul.f32 %v1638_v22, %v7765_v40  ;;  %v7478_v58 = vld [vmem:[%s9089_s9 + $0x18] sm:$0xff]   ;;  %v1642_v57 = vmul.f32 %v1635_v48, %v7767_v41  ;;  %v1825_v28 = vrot.slane %v8096_v31, 1 }
 0x304   :  { %6091 = vmatprep.subr.bf16.mxu1 %v7476_v11  ;;  %v1843_v25 = vpack.c.bf16 %v1831_v13, %v1830_v17 }
 0x305   :  { %v1651_v38 = vpack.c.bf16 %v1640_v36, %v1639_v35  ;;  %v1652_v18 = vpack.c.bf16 %v1642_v57, %v1641_v53  ;;  %v1826_v29 = vsel %vm263_vm3, %v1824_v45, %v1825_v28  ;;  %v1829_v33 = vsel %vm263_vm3, %v1825_v28, %v1822_v46 }
 0x306   :  { %v1832_v10 = vmul.f32 %v1826_v29, %v7785_v55 }
 0x307   :  { %6092 = vmatpush3.bf16.msra.mxu1 %v7476_v11  ;;  %6097 = vmatprep.mubr.msk.bf16.mxu1 %vm371_vm5, %v1651_v38  ;;  %v1833_v11 = vmul.f32 %v1829_v33, %v7783_v54 }
 0x308   :  { %6093 = vmatprep.subr.bf16.mxu1 %v7477_v37 }
 0x309   :  { %v1844_v21 = vpack.c.bf16 %v1833_v11, %v1832_v10 }
 0x30b   :  { %6094 = vmatpush3.bf16.msra.mxu1 %v7477_v37 }
 0x30c   :  { %6095 = vmatprep.subr.bf16.mxu1 %v7478_v58 }
 0x30f   :  { %6096 = vmatpush3.bf16.msra.mxu1 %v7478_v58 }
 0x310   :  { %6101 = vmatprep.subr.bf16.mxu1 %v7479_v59 }
 0x312   :  { %6098 = vmatmul.mubr.msk.bf16.vlgmr.msra.gmra.mrb[4].mxu1 %vm371_vm5, %v1652_v18 }
 0x313   :  { %6102 = vmatpush3.bf16.msra.mxu1 %v7479_v59  ;;  %6109 = vmatprep.mubr.msk.bf16.mxu1 %vm371_vm5, %v1843_v25 }
 0x314   :  { %6103 = vmatprep.subr.bf16.mxu1 %v7480_v24 }
 0x317   :  { %6104 = vmatpush3.bf16.msra.mxu1 %v7480_v24 }
 0x318   :  { %6105 = vmatprep.subr.bf16.mxu1 %v7481_v14 }
 0x31b   :  { %6106 = vmatpush3.bf16.msra.mxu1 %v7481_v14 }
 0x31c   :  { %6107 = vmatprep.subr.bf16.mxu1 %v7482_v20 }
 0x31f   :  { %6108 = vmatpush3.bf16.msra.mxu1 %v7482_v20 }
 0x320   :  { %7021 = vmatprep.subr.bf16.mxu1 %v9121_v0 }
 0x322   :  { %6110 = vmatmul.mubr.msk.bf16.vlgmr.msra.gmra.mrb[4].mxu1 %vm371_vm5, %v1844_v21 }
 0x323   :  { %7023 = vmatpush3.bf16.msra.mxu1 %v7797_v63  ;;  %6243 = vmatprep.mubr.msk.f32.mxu1 %vm7587_vm4, %v9123_v16 }
 0x324   :  { %7024 = vmatprep.subr.bf16.mxu1 %v9121_v0 }
 0x327   :  { %7026 = vmatpush3.bf16.msra.mxu1 %v7811_v6 }
 0x328   :  { %7027 = vmatprep.subr.bf16.mxu1 %v9121_v0 }
 0x32b   :  { %7029 = vmatpush3.bf16.msra.mxu1 %v7829_v15 }
 0x32c   :  { %7030 = vmatprep.subr.bf16.mxu1 %v9121_v0 }
 0x32f   :  { %7032 = vmatpush3.bf16.msra.mxu1 %v7837_v19 }
 0x330   :  { %7033 = vmatprep.subr.bf16.mxu1 %v9121_v0 }
 0x3f5   :  { %v6111_v22 = vpop.f32.mrb[4].mxu1 }
 0x3f6   :  { %v8173_v35 = vadd.f32 %v6111_v22, %v5283_v34  ;;  %v1909_v36 = vpop.f32.mrb[5].mxu1 }
 0x3f7   :  { %v8175_v37 = vadd.f32 %v5283_v34, %v1909_v36  ;;  %v6112_v38 = vpop.f32.mrb[6].mxu1 }
 0x3f8   :  { %v1961_v44 = vmul.f32 %v8173_v35, %v8173_v35  ;;  %v8179_v45 = vadd.f32 %v6112_v38, %v5283_v34  ;;  %v1912_v58 = vpop.f32.mrb[7].mxu1  ;;  %v1950_v48 = vsel %vm371_vm5, %v8173_v35, 0.0 }
 0x3f9   :  { %v1959_v46 = vmul.f32 %v8175_v37, %v8175_v37  ;;  %v8183_v47 = vadd.f32 %v5283_v34, %v1912_v58  ;;  %v1941_v53 = vsel %vm371_vm5, %v8175_v37, 0.0 }
 0x3fa   :  { %v1951_v51 = vsel %vm371_vm5, %v8179_v45, 0.0  ;;  %v1962_v52 = vmul.f32 %v8179_v45, %v8179_v45  ;;  %v1972_v13 = vsel %vm371_vm5, %v1961_v44, 0.0 }
 0x3fb   :  { %v1952_v57 = vadd.f32 %v1951_v51, %v1950_v48  ;;  %v1942_v59 = vsel %vm371_vm5, %v8183_v47, 0.0  ;;  %v1960_v60 = vmul.f32 %v8183_v47, %v8183_v47  ;;  %v1963_v24 = vsel %vm371_vm5, %v1959_v46, 0.0 }
 0x3fc   :  { %v1973_v17 = vsel %vm371_vm5, %v1962_v52, 0.0  ;;  %v1943_v18 = vadd.f32 %v1942_v59, %v1941_v53 }
 0x3fd   :  { %v1953_v25 = vrot.slane %v1952_v57, 4  ;;  %v1974_v14 = vadd.f32 %v1973_v17, %v1972_v13  ;;  %v1964_v28 = vsel %vm371_vm5, %v1960_v60, 0.0 }
 0x3fe   :  { %v1944_v20 = vrot.slane %v1943_v18, 4  ;;  %v1965_v29 = vadd.f32 %v1964_v28, %v1963_v24 }
 0x3ff   :  { %v1954_v33 = vadd.f32 %v1953_v25, %v1952_v57  ;;  %v1975_v10 = vrot.slane %v1974_v14, 4 }
 0x400   :  { %v1945_v11 = vadd.f32 %v1944_v20, %v1943_v18  ;;  %v1966_v21 = vrot.slane %v1965_v29, 4 }
 0x401   :  { %v1955_v34 = vrot.slane %v1954_v33, 2  ;;  %v1976_v22 = vadd.f32 %v1975_v10, %v1974_v14 }
 0x402   :  { %v1946_v36 = vrot.slane %v1945_v11, 2  ;;  %v1967_v38 = vadd.f32 %v1966_v21, %v1965_v29 }
 0x403   :  { %v1956_v44 = vadd.f32 %v1955_v34, %v1954_v33  ;;  %v1977_v58 = vrot.slane %v1976_v22, 2 }
 0x404   :  { %v1947_v48 = vadd.f32 %v1946_v36, %v1945_v11  ;;  %v1968_v51 = vrot.slane %v1967_v38, 2 }
 0x405   :  { %v1957_v52 = vrot.slane %v1956_v44, 1  ;;  %v1978_v46 = vadd.f32 %v1977_v58, %v1976_v22 }
 0x406   :  { %v1948_v53 = vrot.slane %v1947_v48, 1  ;;  %v1969_v59 = vadd.f32 %v1968_v51, %v1967_v38  ;;  %v5284_v51 = vld [vmem:[%s9095_s11] ss:$0 sm:$0xff] }
 0x407   :  { %v1958_v13 = vadd.f32 %v1957_v52, %v1956_v44  ;;  %v1979_v60 = vrot.slane %v1978_v46, 1 }
 0x408   :  { %v1949_v17 = vadd.f32 %v1948_v53, %v1947_v48  ;;  %v1970_v24 = vrot.slane %v1969_v59, 1  ;;  %v5285_v53 = vld [vmem:[%s9096_s12] ss:$0 sm:$0xff] }
 0x409   :  { %v1980_v57 = vadd.f32 %v1979_v60, %v1978_v46 }
 0x40a   :  { %v1971_v25 = vadd.f32 %v1970_v24, %v1969_v59  ;;  %v1983_v18 = vsel %vm414_vm6, %v1958_v13, %v1949_v17 }
 0x40b   :  { %v1984_v14 = vsel %vm371_vm5, %v1983_v18, 0 }
 0x40c   :  { %v8203_v28 = vand.u32 4294901760, %v1984_v14  ;;  %v2525_v20 = vsel %vm414_vm6, %v1980_v57, %v1971_v25 }
 0x40d   :  { %v2526_v29 = vsel %vm371_vm5, %v2525_v20, 0 }
 0x40e   :  { %v8208_v33 = vsub.f32 %v1984_v14, %v8203_v28  ;;  %v8210_v10 = vand.u32 4294901760, %v2526_v29 }
 0x410   :  { %v2061_v11 = vand.u32 4294901760, %v8208_v33  ;;  %v8214_v21 = vsub.f32 %v2526_v29, %v8210_v10 }
 0x412   :  { %v2062_v34 = vsub.f32 %v8208_v33, %v2061_v11  ;;  %v2603_v22 = vand.u32 4294901760, %v8214_v21 }
 0x414   :  { %v2063_v36 = vand.u32 4294901760, %v2062_v34  ;;  %v2604_v38 = vsub.f32 %v8214_v21, %v2603_v22 }
 0x416   :  { %6130 = vmatmul.mubr.f32.vlgmr.msra.gmra.mrb[6].mxu0 %v2063_v36  ;;  %v2605_v44 = vand.u32 4294901760, %v2604_v38 }
 0x417   :  { %6963 = vmatpush3.bf16.msra.mxu0 %v7845_v30  ;;  %6148 = vmatprep.mubr.msk.f32.mxu0 %vm7587_vm4, %v9123_v16 }
 0x418   :  { %6244 = vmatmul.mubr.f32.vlgmr.msra.gmra.mrb[2].mxu1 %v2605_v44  ;;  %6964 = vmatprep.subr.bf16.mxu0 %v9121_v0 }
 0x419   :  { %7035 = vmatpush3.bf16.msra.mxu1 %v7845_v30  ;;  %6262 = vmatprep.mubr.msk.f32.mxu1 %vm7587_vm4, %v9123_v16  ;;  %v8351_v30 = vld [vmem:[%s9093_s13] sm:$0xff]  }
 0x41a   :  { %7036 = vmatprep.subr.bf16.mxu1 %v9121_v0 }
 0x41b   :  { %6966 = vmatpush3.bf16.msra.mxu0 %v7847_v43 }
 0x41c   :  { %6967 = vmatprep.subr.bf16.mxu0 %v9121_v0 }
 0x41d   :  { %7038 = vmatpush3.bf16.msra.mxu1 %v7847_v43  ;;  %v8357_v43 = vld [vmem:[%s9094_s4] sm:$0xff] }
 0x41e   :  { %7039 = vmatprep.subr.bf16.mxu1 %v9121_v0  ;;  %v9162_v42 = vand.u32 4294901760, %v8357_v43 }
 0x41f   :  { %6969 = vmatpush3.bf16.msra.mxu0 %v7849_v56 }
 0x420   :  { %6970 = vmatprep.subr.bf16.mxu0 %v9121_v0  ;;  %v8713_v4 = vsub.f32 %v8357_v43, %v9162_v42 }
 0x421   :  { %7041 = vmatpush3.bf16.msra.mxu1 %v7849_v56  ;;  %v8362_v56 = vld [vmem:[%s9094_s4 + $0x8] sm:$0xff] }
 0x422   :  { %7042 = vmatprep.subr.bf16.mxu1 %v9121_v0 }
 0x423   :  { %6972 = vmatpush3.bf16.msra.mxu0 %v7851_v61 }
 0x424   :  { %6973 = vmatprep.subr.bf16.mxu0 %v9121_v0 }
 0x425   :  { %7044 = vmatpush3.bf16.msra.mxu1 %v7851_v61  ;;  %v9126_v61 = vand.u32 4294901760, %v8357_v43 }
 0x426   :  { %6149 = vmatmul.mubr.f32.vlgmr.msra.gmra.mrb[6].mxu0 %v8203_v28  ;;  %7045 = vmatprep.subr.bf16.mxu1 %v9121_v0 }
 0x427   :  { %6975 = vmatpush3.bf16.msra.mxu0 %v7853_v62  ;;  %6167 = vmatprep.mubr.msk.f32.mxu0 %vm7587_vm4, %v9123_v16 }
 0x428   :  { %6263 = vmatmul.mubr.f32.vlgmr.msra.gmra.mrb[2].mxu1 %v8210_v10  ;;  %6976 = vmatprep.subr.bf16.mxu0 %v9121_v0 }
 0x429   :  { %7047 = vmatpush3.bf16.msra.mxu1 %v7853_v62  ;;  %6281 = vmatprep.mubr.msk.f32.mxu1 %vm7587_vm4, %v9123_v16  ;;  %v9125_v62 = vand.u32 4294901760, %v8362_v56 }
 0x42a   :  { %7048 = vmatprep.subr.bf16.mxu1 %v9121_v0 }
 0x42b   :  { %6978 = vmatpush3.bf16.msra.mxu0 %v7855_v1 }
 0x42c   :  { %6979 = vmatprep.subr.bf16.mxu0 %v9121_v0 }
 0x42d   :  { %7050 = vmatpush3.bf16.msra.mxu1 %v7855_v1  ;;  %v8370_v1 = vpack.c.bf16 %v9125_v62, %v9126_v61 }
 0x42e   :  { %7051 = vmatprep.subr.bf16.mxu1 %v9121_v0 }
 0x42f   :  { %6981 = vmatpush3.bf16.msra.mxu0 %v7857_v2 }
 0x430   :  { %6982 = vmatprep.subr.bf16.mxu0 %v9121_v0 }
 0x431   :  { %7053 = vmatpush3.bf16.msra.mxu1 %v7857_v2 }
 0x432   :  { %7054 = vmatprep.subr.bf16.mxu1 %v9121_v0 }
 0x433   :  { %6984 = vmatpush3.bf16.msra.mxu0 %v7859_v3 }
 0x434   :  { %6985 = vmatprep.subr.bf16.mxu0 %v9121_v0 }
 0x435   :  { %7056 = vmatpush3.bf16.msra.mxu1 %v7859_v3 }
 0x436   :  { %6168 = vmatmul.mubr.f32.vlgmr.msra.gmra.mrb[6].mxu0 %v8208_v33  ;;  %7057 = vmatprep.subr.bf16.mxu1 %v9121_v0 }
 0x437   :  { %6987 = vmatpush3.bf16.msra.mxu0 %v7797_v63  ;;  %6186 = vmatprep.mubr.msk.f32.mxu0 %vm7587_vm4, %v9123_v16 }
 0x438   :  { %6282 = vmatmul.mubr.f32.vlgmr.msra.gmra.mrb[2].mxu1 %v8214_v21  ;;  %6988 = vmatprep.subr.bf16.mxu0 %v9121_v0 }
 0x439   :  { %7059 = vmatpush3.bf16.msra.mxu1 %v7797_v63  ;;  %6300 = vmatprep.mubr.msk.f32.mxu1 %vm7587_vm4, %v9123_v16 }
 0x43a   :  { %7060 = vmatprep.subr.bf16.mxu1 %v9121_v0 }
 0x43b   :  { %6990 = vmatpush3.bf16.msra.mxu0 %v7811_v6 }
 0x43c   :  { %6991 = vmatprep.subr.bf16.mxu0 %v9121_v0 }
 0x43d   :  { %7062 = vmatpush3.bf16.msra.mxu1 %v7811_v6 }
 0x43e   :  { %7063 = vmatprep.subr.bf16.mxu1 %v9121_v0 }
 0x43f   :  { %6993 = vmatpush3.bf16.msra.mxu0 %v7829_v15 }
 0x440   :  { %6994 = vmatprep.subr.bf16.mxu0 %v9121_v0 }
 0x441   :  { %7065 = vmatpush3.bf16.msra.mxu1 %v7829_v15 }
 0x442   :  { %7066 = vmatprep.subr.bf16.mxu1 %v9121_v0 }
 0x443   :  { %6996 = vmatpush3.bf16.msra.mxu0 %v7837_v19 }
 0x444   :  { %6997 = vmatprep.subr.bf16.mxu0 %v9121_v0 }
 0x445   :  { %7068 = vmatpush3.bf16.msra.mxu1 %v7837_v19 }
 0x446   :  { %6187 = vmatmul.mubr.f32.vlgmr.msra.gmra.mrb[6].mxu0 %v2061_v11  ;;  %7069 = vmatprep.subr.bf16.mxu1 %v9121_v0 }
 0x447   :  { %6999 = vmatpush3.bf16.msra.mxu0 %v7861_v5  ;;  %6205 = vmatprep.mubr.msk.f32.mxu0 %vm7587_vm4, %v9123_v16 }
 0x448   :  { %6301 = vmatmul.mubr.f32.vlgmr.msra.gmra.mrb[2].mxu1 %v2603_v22  ;;  %7000 = vmatprep.subr.bf16.mxu0 %v9121_v0 }
 0x449   :  { %7071 = vmatpush3.bf16.msra.mxu1 %v7861_v5  ;;  %6319 = vmatprep.mubr.msk.f32.mxu1 %vm7587_vm4, %v9123_v16 }
 0x44a   :  { %7072 = vmatprep.subr.bf16.mxu1 %v9121_v0 }
 0x44b   :  { %7002 = vmatpush3.bf16.msra.mxu0 %v7863_v7 }
 0x44c   :  { %7003 = vmatprep.subr.bf16.mxu0 %v9121_v0 }
 0x44d   :  { %7074 = vmatpush3.bf16.msra.mxu1 %v7863_v7 }
 0x44e   :  { %7075 = vmatprep.subr.bf16.mxu1 %v9121_v0 }
 0x44f   :  { %7005 = vmatpush3.bf16.msra.mxu0 %v7865_v8 }
 0x450   :  { %7006 = vmatprep.subr.bf16.mxu0 %v9121_v0 }
 0x451   :  { %7077 = vmatpush3.bf16.msra.mxu1 %v7865_v8 }
 0x452   :  { %7078 = vmatprep.subr.bf16.mxu1 %v9121_v0 }
 0x453   :  { %7008 = vmatpush3.bf16.msra.mxu0 %v7867_v9 }
 0x454   :  { %7009 = vmatprep.subr.bf16.mxu0 %v9121_v0 }
 0x455   :  { %7080 = vmatpush3.bf16.msra.mxu1 %v7867_v9 }
 0x456   :  { %6206 = vmatmul.mubr.f32.vlgmr.msra.gmra.mrb[6].mxu0 %v8203_v28  ;;  %7081 = vmatprep.subr.bf16.mxu1 %v9121_v0 }
 0x457   :  { %7011 = vmatpush3.bf16.msra.mxu0 %v7797_v63  ;;  %6224 = vmatprep.mubr.msk.f32.mxu0 %vm7587_vm4, %v9123_v16 }
 0x458   :  { %6320 = vmatmul.mubr.f32.vlgmr.msra.gmra.mrb[2].mxu1 %v8210_v10  ;;  %7012 = vmatprep.subr.bf16.mxu0 %v9121_v0 }
 0x459   :  { %7083 = vmatpush3.bf16.msra.mxu1 %v7797_v63  ;;  %6338 = vmatprep.mubr.msk.f32.mxu1 %vm7587_vm4, %v9123_v16  ;;  %v7483_v63 = vld [vmem:[%s9093_s13 + $0x20] sm:$0xff]  }
 0x45a   :  { %7084 = vmatprep.subr.bf16.mxu1 %v9121_v0 }
 0x45b   :  { %7014 = vmatpush3.bf16.msra.mxu0 %v7811_v6 }
 0x45c   :  { %7015 = vmatprep.subr.bf16.mxu0 %v9121_v0 }
 0x45d   :  { %7086 = vmatpush3.bf16.msra.mxu1 %v7811_v6  ;;  %v7484_v6 = vld [vmem:[%s9093_s13 + $0x28] sm:$0xff]  }
 0x45e   :  { %7087 = vmatprep.subr.bf16.mxu1 %v9121_v0 }
 0x45f   :  { %7017 = vmatpush3.bf16.msra.mxu0 %v7829_v15 }
 0x460   :  { %7018 = vmatprep.subr.bf16.mxu0 %v9121_v0 }
 0x461   :  { %7089 = vmatpush3.bf16.msra.mxu1 %v7829_v15  ;;  %v7485_v15 = vld [vmem:[%s9093_s13 + $0x30] sm:$0xff]  }
 0x462   :  { %7090 = vmatprep.subr.bf16.mxu1 %v9121_v0 }
 0x463   :  { %7020 = vmatpush3.bf16.msra.mxu0 %v7837_v19 }
 0x464   :  { %6341 = vmatprep.subr.bf16.mxu0 %v7483_v63 }
 0x465   :  { %7092 = vmatpush3.bf16.msra.mxu1 %v7837_v19  ;;  %v7486_v19 = vld [vmem:[%s9093_s13 + $0x38] sm:$0xff]  }
 0x466   :  { %6225 = vmatmul.mubr.f32.vlgmr.msra.gmra.mrb[6].mxu0 %v8203_v28  ;;  %7093 = vmatprep.subr.bf16.mxu1 %v9121_v0 }
 0x467   :  { %6342 = vmatpush3.bf16.msra.mxu0 %v7483_v63 }
 0x468   :  { %6339 = vmatmul.mubr.f32.vlgmr.msra.gmra.mrb[2].mxu1 %v8210_v10  ;;  %6343 = vmatprep.subr.bf16.mxu0 %v7484_v6 }
 0x469   :  { %6397 = vmatprep.mubr.msk.f32.mxu1 %vm7587_vm4, %v9123_v16  ;;  %7095 = vmatpush3.bf16.msra.mxu1 %v8370_v1 }
 0x46a   :  { %7096 = vmatprep.subr.bf16.mxu1 %v9121_v0 }
 0x46b   :  { %6344 = vmatpush3.bf16.msra.mxu0 %v7484_v6 }
 0x46c   :  { %6345 = vmatprep.subr.bf16.mxu0 %v7485_v15 }
 0x46f   :  { %6346 = vmatpush3.bf16.msra.mxu0 %v7485_v15 }
 0x470   :  { %6347 = vmatprep.subr.bf16.mxu0 %v7486_v19 }
 0x473   :  { %6348 = vmatpush3.bf16.msra.mxu0 %v7486_v19 }
 0x474   :  { %6353 = vmatprep.subr.bf16.mxu0 %v8351_v30 }
 0x539   :  { %v2519_v2 = vpop.f32.mrb[6].mxu0 }
 0x53a   :  { %v3065_v3 = vmul.f32 %v2519_v2, %v2519_v2  ;;  %v6226_v5 = vpop.f32.mrb[7].mxu0 }
 0x53b   :  { %v3061_v7 = vpop.f32.mrb[2].mxu1 }
 0x53c   :  { %v3066_v8 = vsub.f32 %v3061_v7, %v3065_v3  ;;  %v6340_v9 = vpop.f32.mrb[3].mxu1 }
 0x53e   :  { %v3067_v58 = vmax.f32 %v3066_v8, 0.0 }
 0x540   :  { %v3068_v48 = vadd.f32 1e-05, %v3067_v58 }
 0x542   :  { %7533 = vrsqrt.f32 %v3068_v48 }
 0x54c   :  { %v7534_v52 = vpop.eup %7533 }
 0x54d   :  { %v3076_v46 = vmul.f32 %v7534_v52, %v5284_v51 }
 0x54f   :  { %v3077_v59 = vmul.f32 %v3076_v46, %v2519_v2  ;;  %v3092_v13 = vrot.slane %v3076_v46, %v8065_v27 }
 0x551   :  { %v3084_v60 = vsub.f32 %v5285_v53, %v3077_v59  ;;  %v3093_v17 = vcombine.high %v3092_v13, %v3092_v13  ;;  %v3100_v24 = vrot.slane %v3092_v13, %v8065_v27 }
 0x553   :  { %v3107_v57 = vrot.slane %v3093_v17, %v8065_v27  ;;  %v3129_v25 = vrot.slane %v3084_v60, %v8065_v27  ;;  %v3111_v18 = vrot.slane %v3100_v24, %v8071_v32 }
 0x555   :  { %v3115_v14 = vrot.slane %v3107_v57, %v8071_v32  ;;  %v3130_v28 = vcombine.high %v3129_v25, %v3129_v25  ;;  %v3137_v20 = vrot.slane %v3129_v25, %v8065_v27  ;;  %v3118_v33 = vmul.f32 %v3111_v18, %v8175_v37 }
 0x556   :  { %v3119_v10 = vmul.f32 %v3111_v18, %v8183_v47 }
 0x557   :  { %v3144_v29 = vrot.slane %v3130_v28, %v8065_v27  ;;  %v3148_v11 = vrot.slane %v3137_v20, %v8071_v32  ;;  %v3121_v21 = vmul.f32 %v3115_v14, %v8179_v45  ;;  %v3120_v34 = vmul.f32 %v3115_v14, %v8173_v35 }
 0x559   :  { %v3152_v22 = vrot.slane %v3144_v29, %v8071_v32  ;;  %v3155_v36 = vadd.f32 %v3148_v11, %v3118_v33  ;;  %v3156_v38 = vadd.f32 %v3148_v11, %v3119_v10 }
 0x55b   :  { %v3157_v44 = vadd.f32 %v3152_v22, %v3120_v34  ;;  %v3158_v63 = vadd.f32 %v3152_v22, %v3121_v21  ;;  %v3159_v6 = vmin.f32 %v3155_v36, 30.0  ;;  %v3160_v15 = vmin.f32 %v3156_v38, 30.0 }
 0x55d   :  { %v3161_v19 = vmin.f32 %v3157_v44, 30.0  ;;  %v3162_v2 = vmin.f32 %v3158_v63, 30.0  ;;  %v3163_v3 = vmul.f32 1.442695, %v3159_v6  ;;  %v3165_v37 = vmul.f32 1.442695, %v3160_v15 }
 0x55f   :  { %v3167_v5 = vmul.f32 1.442695, %v3161_v19  ;;  %v3169_v47 = vmul.f32 1.442695, %v3162_v2  ;;  %7535 = vpow2.f32 %v3163_v3 }
 0x560   :  { %7537 = vpow2.f32 %v3165_v37 }
 0x561   :  { %7539 = vpow2.f32 %v3167_v5 }
 0x562   :  { %7541 = vpow2.f32 %v3169_v47 }
 0x569   :  { %v7536_v45 = vpop.eup %7535 }
 0x56a   :  { %v7538_v35 = vpop.eup %7537  ;;  %v3171_v7 = vadd.f32 2.0, %v7536_v45 }
 0x56b   :  { %v7540_v8 = vpop.eup %7539  ;;  %v3172_v9 = vadd.f32 2.0, %v7538_v35 }
 0x56c   :  { %v7542_v58 = vpop.eup %7541  ;;  %v3173_v48 = vadd.f32 2.0, %v7540_v8  ;;  %v3175_v51 = vmul.f32 %v7536_v45, %v3171_v7 }
 0x56d   :  { %v3176_v52 = vmul.f32 %v7538_v35, %v3172_v9  ;;  %v3174_v46 = vadd.f32 2.0, %v7542_v58 }
 0x56e   :  { %v3177_v53 = vmul.f32 %v7540_v8, %v3173_v48  ;;  %v3179_v59 = vadd.f32 2.0, %v3175_v51  ;;  %v7488_v51 = vld [vmem:[%s9093_s13 + $0x8] sm:$0xff]  }
 0x56f   :  { %v3180_v13 = vadd.f32 2.0, %v3176_v52  ;;  %v3178_v60 = vmul.f32 %v7542_v58, %v3174_v46  ;;  %v7489_v52 = vld [vmem:[%s9093_s13 + $0x10] sm:$0xff]   ;;  %v7490_v46 = vld [vmem:[%s9093_s13 + $0x18] sm:$0xff]  }
 0x570   :  { %v3181_v17 = vadd.f32 2.0, %v3177_v53  ;;  %7543 = vrcp.f32 %v3179_v59  ;;  %v82_v53 = vld [vmem:[%s9094_s4 + $0x18] sm:$0xff] }
 0x571   :  { %7545 = vrcp.f32 %v3180_v13  ;;  %v3182_v24 = vadd.f32 2.0, %v3178_v60  ;;  %v3453_v13 = vand.u32 4294901760, %v82_v53 }
 0x572   :  { %7547 = vrcp.f32 %v3181_v17  ;;  %v8440_v17 = vld [vmem:[%s9094_s4 + $0x20] sm:$0xff] }
 0x573   :  { %7549 = vrcp.f32 %v3182_v24  ;;  %v8445_v24 = vld [vmem:[%s9094_s4 + $0x28] sm:$0xff] }
 0x57a   :  { %v7544_v57 = vpop.eup %7543 }
 0x57b   :  { %v7546_v25 = vpop.eup %7545  ;;  %v3187_v18 = vmul.f32 2.0, %v7544_v57  ;;  %v3456_v57 = vand.u32 4294901760, %v8440_v17 }
 0x57c   :  { %v7548_v14 = vpop.eup %7547  ;;  %v3188_v28 = vmul.f32 2.0, %v7546_v25  ;;  %v3459_v25 = vand.u32 4294901760, %v8445_v24 }
 0x57d   :  { %v7550_v20 = vpop.eup %7549  ;;  %v3189_v29 = vmul.f32 2.0, %v7548_v14  ;;  %v3191_v33 = vsub.f32 1.0, %v3187_v18  ;;  %v8458_v14 = vld [vmem:[%s9094_s4 + $0x30] sm:$0xff] }
 0x57e   :  { %v3192_v10 = vsub.f32 1.0, %v3188_v28  ;;  %v3190_v11 = vmul.f32 2.0, %v7550_v20  ;;  %v8453_v18 = vpack.c.bf16 %v3459_v25, %v3456_v57  ;;  %v8463_v28 = vld [vmem:[%s9094_s4 + $0x38] sm:$0xff]  ;;  %v3462_v20 = vand.u32 4294901760, %v8458_v14 }
 0x57f   :  { %v3193_v21 = vsub.f32 1.0, %v3189_v29  ;;  %v3195_v34 = vmul.f32 %v3191_v33, %v3155_v36  ;;  %v3465_v29 = vand.u32 4294901760, %v8463_v28 }
 0x580   :  { %v3196_v22 = vmul.f32 %v3192_v10, %v3156_v38  ;;  %v3194_v6 = vsub.f32 1.0, %v3190_v11  ;;  %v8476_v10 = vld [vmem:[%s9094_s4 + $0x40] sm:$0xff]  ;;  %v8481_v11 = vld [vmem:[%s9094_s4 + $0x48] sm:$0xff] }
 0x581   :  { %v3197_v15 = vmul.f32 %v3193_v21, %v3157_v44  ;;  %v3199_v19 = vadd.f32 %v3195_v34, %v8087_v26  ;;  %v8471_v33 = vpack.c.bf16 %v3465_v29, %v3462_v20  ;;  %v3468_v21 = vand.u32 4294901760, %v8476_v10 }
 0x582   :  { %v3200_v2 = vadd.f32 %v3196_v22, %v8089_v23  ;;  %v3198_v3 = vmul.f32 %v3194_v6, %v3158_v63  ;;  %v3471_v34 = vand.u32 4294901760, %v8481_v11  ;;  %v8494_v6 = vld [vmem:[%s9094_s4 + $0x50] sm:$0xff] }
 0x583   :  { %v3201_v37 = vadd.f32 %v3197_v15, %v8091_v12  ;;  %v3213_v5 = vrot.slane %v3199_v19, 1  ;;  %v8499_v15 = vld [vmem:[%s9094_s4 + $0x58] sm:$0xff] }
 0x584   :  { %v3214_v47 = vrot.slane %v3200_v2, 1  ;;  %v3202_v45 = vadd.f32 %v3198_v3, %v8096_v31  ;;  %v3211_v35 = vpack.c.bf16 %v3200_v2, %v3199_v19  ;;  %v8489_v22 = vpack.c.bf16 %v3471_v34, %v3468_v21 }
 0x585   :  { %v3215_v7 = vrot.slane %v3201_v37, 1  ;;  %v3474_v19 = vand.u32 4294901760, %v8494_v6  ;;  %v3477_v2 = vand.u32 4294901760, %v8499_v15 }
 0x586   :  { %v3219_v8 = vsel %vm263_vm3, %v3213_v5, %v3214_v47  ;;  %v3216_v36 = vrot.slane %v3202_v45, 1  ;;  %v3212_v38 = vpack.c.bf16 %v3202_v45, %v3201_v37  ;;  %v8512_v37 = vld [vmem:[%s9094_s4 + $0x60] sm:$0xff] }
 0x587   :  { %v3218_v44 = vsel %vm263_vm3, %v3214_v47, %v3215_v7  ;;  %v3221_v26 = vmul.f32 %v3219_v8, %v7777_v50  ;;  %v8507_v3 = vpack.c.bf16 %v3477_v2, %v3474_v19  ;;  %v3480_v47 = vand.u32 4294901760, %v8512_v37 }
 0x588   :  { %v3222_v23 = vmul.f32 %v3218_v44, %v7775_v49  ;;  %v3217_v12 = vsel %vm263_vm3, %v3215_v7, %v3216_v36  ;;  %v3220_v31 = vsel %vm263_vm3, %v3216_v36, %v3213_v5  ;;  %v8517_v5 = vld [vmem:[%s9094_s4 + $0x68] sm:$0xff]  ;;  %v8533_v7 = vld [vmem:[%s9094_s4 + $0x78] sm:$0xff] }
 0x589   :  { %v3223_v63 = vmul.f32 %v3217_v12, %v7785_v55  ;;  %v3224_v9 = vmul.f32 %v3220_v31, %v7783_v54  ;;  %v3483_v45 = vand.u32 4294901760, %v8517_v5 }
 0x58a   :  { %v3234_v58 = vpack.c.bf16 %v3222_v23, %v3221_v26  ;;  %v8547_v23 = vsub.f32 %v82_v53, %v3453_v13 }
 0x58b   :  { %v3235_v48 = vpack.c.bf16 %v3224_v9, %v3223_v63  ;;  %v8535_v8 = vpack.c.bf16 %v3483_v45, %v3480_v47 }
 0x58c   :  { %6349 = vmatprep.mubr.msk.bf16.mxu0 %vm371_vm5, %v3234_v58  ;;  %v9119_v31 = vand.u32 4294901760, %v8547_v23  ;;  %v8562_v58 = vsub.f32 %v8440_v17, %v3456_v57  ;;  %v8578_v17 = vsub.f32 %v8463_v28, %v3465_v29  ;;  %v8592_v28 = vsub.f32 %v8476_v10, %v3468_v21 }
 0x58d   :  { %6350 = vmatmul.mubr.msk.bf16.vlgmr.msra.gmra.mrb[8].mxu0 %vm371_vm5, %v3235_v48  ;;  %v8565_v48 = vsub.f32 %v8445_v24, %v3459_v25  ;;  %v8613_v21 = vsub.f32 %v8499_v15, %v3477_v2 }
 0x58e   :  { %6354 = vmatpush3.bf16.msra.mxu0 %v8351_v30  ;;  %6361 = vmatprep.mubr.msk.bf16.mxu0 %vm371_vm5, %v3211_v35  ;;  %v81_v30 = vld [vmem:[%s9094_s4 + $0x10] sm:$0xff]  ;;  %v3559_v9 = vsub.f32 %v8547_v23, %v9119_v31 }
 0x58f   :  { %6355 = vmatprep.subr.bf16.mxu0 %v7488_v51  ;;  %v3450_v59 = vand.u32 4294901760, %v81_v30  ;;  %v8528_v35 = vld [vmem:[%s9094_s4 + $0x70] sm:$0xff] }
 0x590   :  { %v3486_v36 = vand.u32 4294901760, %v8528_v35 }
 0x591   :  { %v8435_v60 = vpack.c.bf16 %v3453_v13, %v3450_v59  ;;  %v8545_v26 = vsub.f32 %v81_v30, %v3450_v59  ;;  %v9107_v30 = vand.u32 4294901760, %v8565_v48  ;;  %v8575_v13 = vsub.f32 %v8458_v14, %v3462_v20 }
 0x592   :  { %6356 = vmatpush3.bf16.msra.mxu0 %v7488_v51  ;;  %v8595_v20 = vsub.f32 %v8481_v11, %v3471_v34  ;;  %v8610_v11 = vsub.f32 %v8494_v6, %v3474_v19  ;;  %v8626_v6 = vsub.f32 %v8517_v5, %v3483_v45  ;;  %v8640_v5 = vsub.f32 %v8528_v35, %v3486_v36 }
 0x593   :  { %6357 = vmatprep.subr.bf16.mxu0 %v7489_v52  ;;  %7098 = vmatpush3.bf16.msra.mxu1 %v8435_v60  ;;  %v9120_v12 = vand.u32 4294901760, %v8545_v26  ;;  %v3573_v24 = vsub.f32 %v8565_v48, %v9107_v30  ;;  %v9118_v25 = vand.u32 4294901760, %v8575_v13 }
 0x594   :  { %7099 = vmatprep.subr.bf16.mxu1 %v9121_v0  ;;  %v9116_v30 = vand.u32 4294901760, %v8595_v20 }
 0x595   :  { %v3552_v63 = vsub.f32 %v8545_v26, %v9120_v12 }
 0x596   :  { %6358 = vmatpush3.bf16.msra.mxu0 %v7489_v52  ;;  %v3560_v52 = vand.u32 4294901760, %v3559_v9  ;;  %v3574_v9 = vand.u32 4294901760, %v3573_v24  ;;  %v9117_v24 = vand.u32 4294901760, %v8592_v28  ;;  %v3601_v10 = vsub.f32 %v8595_v20, %v9116_v30 }
 0x597   :  { %6359 = vmatprep.subr.bf16.mxu0 %v7490_v46  ;;  %7101 = vmatpush3.bf16.msra.mxu1 %v8453_v18  ;;  %v3553_v51 = vand.u32 4294901760, %v3552_v63  ;;  %v9109_v63 = vand.u32 4294901760, %v8578_v17 }
 0x598   :  { %7102 = vmatprep.subr.bf16.mxu1 %v9121_v0 }
 0x599   :  { %v8569_v53 = vpack.c.bf16 %v3560_v52, %v3553_v51  ;;  %v3580_v51 = vsub.f32 %v8575_v13, %v9118_v25  ;;  %v3587_v14 = vsub.f32 %v8578_v17, %v9109_v63  ;;  %v3594_v63 = vsub.f32 %v8592_v28, %v9117_v24 }
 0x59a   :  { %6360 = vmatpush3.bf16.msra.mxu0 %v7490_v46  ;;  %v9108_v46 = vand.u32 4294901760, %v8562_v58 }
 0x59b   :  { %7237 = vmatprep.subr.bf16.mxu0 %v9121_v0  ;;  %7104 = vmatpush3.bf16.msra.mxu1 %v8471_v33  ;;  %v3581_v52 = vand.u32 4294901760, %v3580_v51  ;;  %v3595_v34 = vand.u32 4294901760, %v3594_v63  ;;  %v9110_v51 = vand.u32 4294901760, %v8613_v21  ;;  %v9112_v63 = vand.u32 4294901760, %v8626_v6 }
 0x59c   :  { %7105 = vmatprep.subr.bf16.mxu1 %v9121_v0  ;;  %v3566_v59 = vsub.f32 %v8562_v58, %v9108_v46 }
 0x59d   :  { %6362 = vmatmul.mubr.msk.bf16.vlgmr.msra.gmra.mrb[8].mxu0 %vm371_vm5, %v3212_v38  ;;  %v3489_v38 = vand.u32 4294901760, %v8533_v7  ;;  %v3615_v15 = vsub.f32 %v8613_v21, %v9110_v51 }
 0x59e   :  { %7239 = vmatpush3.bf16.msra.mxu0 %v8370_v1  ;;  %6607 = vmatprep.mubr.msk.f32.mxu0 %vm7587_vm4, %v9123_v16  ;;  %v3567_v57 = vand.u32 4294901760, %v3566_v59  ;;  %v3588_v59 = vand.u32 4294901760, %v3587_v14 }
 0x59f   :  { %7240 = vmatprep.subr.bf16.mxu0 %v9121_v0  ;;  %7107 = vmatpush3.bf16.msra.mxu1 %v8489_v22  ;;  %v8541_v44 = vpack.c.bf16 %v3489_v38, %v3486_v36 }
 0x5a0   :  { %7108 = vmatprep.subr.bf16.mxu1 %v9121_v0  ;;  %v8597_v29 = vpack.c.bf16 %v3574_v9, %v3567_v57  ;;  %v8601_v46 = vpack.c.bf16 %v3588_v59, %v3581_v52  ;;  %v3602_v57 = vand.u32 4294901760, %v3601_v10  ;;  %v9111_v9 = vand.u32 4294901760, %v8610_v11 }
 0x5a1   :  { %v8623_v59 = vsub.f32 %v8512_v37, %v3480_v47  ;;  %v3616_v10 = vand.u32 4294901760, %v3615_v15  ;;  %v3629_v37 = vsub.f32 %v8626_v6, %v9112_v63  ;;  %v8643_v47 = vsub.f32 %v8533_v7, %v3489_v38 }
 0x5a2   :  { %7242 = vmatpush3.bf16.msra.mxu0 %v8435_v60  ;;  %v8617_v14 = vpack.c.bf16 %v3602_v57, %v3595_v34  ;;  %v3608_v52 = vsub.f32 %v8610_v11, %v9111_v9  ;;  %v9114_v15 = vand.u32 4294901760, %v8640_v5 }
 0x5a3   :  { %7243 = vmatprep.subr.bf16.mxu0 %v9121_v0  ;;  %7110 = vmatpush3.bf16.msra.mxu1 %v8507_v3  ;;  %v9115_v2 = vand.u32 4294901760, %v8623_v59  ;;  %v9113_v51 = vand.u32 4294901760, %v8643_v47 }
 0x5a4   :  { %7111 = vmatprep.subr.bf16.mxu1 %v9121_v0  ;;  %v3609_v19 = vand.u32 4294901760, %v3608_v52  ;;  %v3630_v52 = vand.u32 4294901760, %v3629_v37  ;;  %v3636_v63 = vsub.f32 %v8640_v5, %v9114_v15  ;;  %v8673_v37 = vpack.c.bf16 %v8595_v20, %v8592_v28 }
 0x5a5   :  { %v3622_v34 = vsub.f32 %v8623_v59, %v9115_v2  ;;  %v3643_v35 = vsub.f32 %v8643_v47, %v9113_v51 }
 0x5a6   :  { %7245 = vmatpush3.bf16.msra.mxu0 %v8453_v18  ;;  %v8645_v45 = vpack.c.bf16 %v3616_v10, %v3609_v19  ;;  %v3637_v7 = vand.u32 4294901760, %v3636_v63  ;;  %v8661_v19 = vpack.c.bf16 %v8547_v23, %v8545_v26  ;;  %v8665_v10 = vpack.c.bf16 %v8565_v48, %v8562_v58 }
 0x5a7   :  { %7246 = vmatprep.subr.bf16.mxu0 %v9121_v0  ;;  %7113 = vmatpush3.bf16.msra.mxu1 %v8535_v8  ;;  %v3623_v57 = vand.u32 4294901760, %v3622_v34  ;;  %v3644_v36 = vand.u32 4294901760, %v3643_v35  ;;  %v8669_v34 = vpack.c.bf16 %v8578_v17, %v8575_v13  ;;  %v8677_v63 = vpack.c.bf16 %v8613_v21, %v8610_v11  ;;  %v5306_v35 = vld [vmem:[%s9097_s14] ss:$0 sm:$0xff] }
 0x5a8   :  { %7114 = vmatprep.subr.bf16.mxu1 %v9121_v0 }
 0x5a9   :  { %v8649_v9 = vpack.c.bf16 %v3630_v52, %v3623_v57  ;;  %v8657_v38 = vpack.c.bf16 %v3644_v36, %v3637_v7  ;;  %v8681_v57 = vpack.c.bf16 %v8626_v6, %v8623_v59  ;;  %v8685_v52 = vpack.c.bf16 %v8643_v47, %v8640_v5 }
 0x5aa   :  { %7248 = vmatpush3.bf16.msra.mxu0 %v8471_v33 }
 0x5ab   :  { %7249 = vmatprep.subr.bf16.mxu0 %v9121_v0  ;;  %7116 = vmatpush3.bf16.msra.mxu1 %v8541_v44 }
 0x5ac   :  { %7117 = vmatprep.subr.bf16.mxu1 %v9121_v0 }
 0x5ae   :  { %7251 = vmatpush3.bf16.msra.mxu0 %v8489_v22 }
 0x5af   :  { %7252 = vmatprep.subr.bf16.mxu0 %v9121_v0 }
 0x5b2   :  { %7254 = vmatpush3.bf16.msra.mxu0 %v8507_v3 }
 0x5b3   :  { %7255 = vmatprep.subr.bf16.mxu0 %v9121_v0 }
 0x5b6   :  { %7257 = vmatpush3.bf16.msra.mxu0 %v8535_v8 }
 0x5b7   :  { %7258 = vmatprep.subr.bf16.mxu0 %v9121_v0 }
 0x5ba   :  { %7260 = vmatpush3.bf16.msra.mxu0 %v8541_v44 }
 0x5bb   :  { %7261 = vmatprep.subr.bf16.mxu0 %v9121_v0 }
 0x670   :  { %v6363_v7 = vpop.f32.mrb[8].mxu0 }
 0x671   :  { %v8690_v36 = vadd.f32 %v6363_v7, %v5306_v35  ;;  %v3379_v51 = vpop.f32.mrb[9].mxu0 }
 0x672   :  { %v8692_v15 = vadd.f32 %v5306_v35, %v3379_v51  ;;  %v6364_v2 = vpop.f32.mrb[10].mxu0 }
 0x673   :  { %9158 = vst [vmem:[#allocation11_spill] sm:$0xff] %v8690_v36  ;;  %v8694_v30 = vadd.f32 %v6364_v2, %v5306_v35  ;;  %v3382_v24 = vpop.f32.mrb[11].mxu0  ;;  %v3423_v31 = vmul.f32 %v8690_v36, %v8690_v36 }
 0x674   :  { %9159 = vst [vmem:[#allocation12_spill] sm:$0xff] %v8692_v15  ;;  %v8696_v25 = vadd.f32 %v5306_v35, %v3382_v24  ;;  %v3421_v7 = vmul.f32 %v8692_v15, %v8692_v15 }
 0x675   :  { %9160 = vst [vmem:[#allocation13_spill] sm:$0xff] %v8694_v30  ;;  %v3414_v12 = vadd.f32 %v8694_v30, %v8690_v36  ;;  %v3424_v0 = vmul.f32 %v8694_v30, %v8694_v30  ;;  %v9163_v36 = vand.u32 4294901760, %v8362_v56 }
 0x676   :  { %9161 = vst [vmem:[#allocation14_spill] sm:$0xff] %v8696_v25  ;;  %v3407_v51 = vadd.f32 %v8696_v25, %v8692_v15  ;;  %v3422_v2 = vmul.f32 %v8696_v25, %v8696_v25 }
 0x677   :  { %v3415_v24 = vrot.slane %v3414_v12, 4  ;;  %v3432_v35 = vadd.f32 %v3424_v0, %v3423_v31  ;;  %v8718_v30 = vsub.f32 %v8362_v56, %v9163_v36 }
 0x678   :  { %v3408_v16 = vrot.slane %v3407_v51, 4  ;;  %v3425_v62 = vadd.f32 %v3422_v2, %v3421_v7 }
 0x679   :  { %v3416_v61 = vadd.f32 %v3415_v24, %v3414_v12  ;;  %v3433_v41 = vrot.slane %v3432_v35, 4 }
 0x67a   :  { %v3409_v39 = vadd.f32 %v3408_v16, %v3407_v51  ;;  %v3426_v55 = vrot.slane %v3425_v62, 4 }
 0x67b   :  { %v3417_v49 = vrot.slane %v3416_v61, 2  ;;  %v3434_v54 = vadd.f32 %v3433_v41, %v3432_v35 }
 0x67c   :  { %v3410_v40 = vrot.slane %v3409_v39, 2  ;;  %v3427_v50 = vadd.f32 %v3426_v55, %v3425_v62  ;;  %v3537_v55 = vand.u32 4294901760, %v8713_v4  ;;  %v3544_v62 = vand.u32 4294901760, %v8718_v30 }
 0x67d   :  { %v3418_v0 = vadd.f32 %v3417_v49, %v3416_v61  ;;  %v3435_v31 = vrot.slane %v3434_v54, 2 }
 0x67e   :  { %v3411_v12 = vadd.f32 %v3410_v40, %v3409_v39  ;;  %v3428_v7 = vrot.slane %v3427_v50, 2  ;;  %v3538_v39 = vsub.f32 %v8713_v4, %v3537_v55  ;;  %v3545_v40 = vsub.f32 %v8718_v30, %v3544_v62 }
 0x67f   :  { %v3419_v16 = vrot.slane %v3418_v0, 1  ;;  %v3436_v51 = vadd.f32 %v3435_v31, %v3434_v54 }
 0x680   :  { %v3412_v2 = vrot.slane %v3411_v12, 1  ;;  %v3429_v41 = vadd.f32 %v3428_v7, %v3427_v50  ;;  %v3539_v36 = vand.u32 4294901760, %v3538_v39  ;;  %v7512_v39 = vld [vmem:[%s9098_s17 + $0x78] sm:$0xff]  }
 0x681   :  { %v3420_v24 = vadd.f32 %v3419_v16, %v3418_v0  ;;  %v3437_v42 = vrot.slane %v3436_v51, 1  ;;  %v3546_v0 = vand.u32 4294901760, %v3545_v40  ;;  %v7513_v40 = vld [vmem:[%s9098_s17 + $0xb8] sm:$0xff]  }
 0x682   :  { %v3413_v43 = vadd.f32 %v3412_v2, %v3411_v12  ;;  %v3430_v35 = vrot.slane %v3429_v41, 1 }
 0x683   :  { %v3438_v25 = vadd.f32 %v3437_v42, %v3436_v51  ;;  %v7118_v51 = vpack.c.bf16 %v3546_v0, %v3539_v36  ;;  %v7508_v42 = vld [vmem:[%s9098_s17 + $0x28] sm:$0xff]  }
 0x684   :  { %v3431_v15 = vadd.f32 %v3430_v35, %v3429_v41  ;;  %v3441_v56 = vsel %vm414_vm6, %v3420_v24, %v3413_v43  ;;  %v9164_v41 = vmov 0.0   ;;  %v9165_v24 = vmov 0.0|0.0   ;;  %v7509_v43 = vld [vmem:[%s9098_s17 + $0x70] sm:$0xff]  }
 0x685   :  { %v8729_v49 = vand.u32 4294901760, %v3441_v56  ;;  %v7510_v35 = vld [vmem:[%s9098_s17 + $0xb0] sm:$0xff]  }
 0x686   :  { %v4086_v50 = vsel %vm414_vm6, %v3438_v25, %v3431_v15 }
 0x687   :  { %v8733_v54 = vsub.f32 %v3441_v56, %v8729_v49  ;;  %v8735_v61 = vand.u32 4294901760, %v4086_v50  ;;  %v7511_v56 = vld [vmem:[%s9098_s17 + $0x30] sm:$0xff]  }
 0x689   :  { %v3526_v31 = vand.u32 4294901760, %v8733_v54  ;;  %v8739_v12 = vsub.f32 %v4086_v50, %v8735_v61 }
 0x68b   :  { %v3527_v7 = vsub.f32 %v8733_v54, %v3526_v31  ;;  %v4171_v16 = vand.u32 4294901760, %v8739_v12 }
 0x68d   :  { %v3528_v25 = vand.u32 4294901760, %v3527_v7  ;;  %v4172_v15 = vsub.f32 %v8739_v12, %v4171_v16 }
 0x68f   :  { %6398 = vmatmul.mubr.f32.vlgmr.msra.gmra.mrb[8].mxu1 %v3528_v25  ;;  %v4173_v2 = vand.u32 4294901760, %v4172_v15  ;;  %v5308_v15 = vld [vmem:[%s9100_s16] ss:$0 sm:$0xff] }
 0x690   :  { %7119 = vmatpush3.bf16.msra.mxu1 %v7118_v51  ;;  %6432 = vmatprep.mubr.msk.f32.mxu1 %vm7587_vm4, %v9164_v41 }
 0x691   :  { %6608 = vmatmul.mubr.f32.vlgmr.msra.gmra.mrb[12].mxu0 %v4173_v2  ;;  %7120 = vmatprep.subr.bf16.mxu1 %v9165_v24 }
 0x692   :  { %7263 = vmatpush3.bf16.msra.mxu0 %v7118_v51  ;;  %6642 = vmatprep.mubr.msk.f32.mxu0 %vm7587_vm4, %v9164_v41 }
 0x693   :  { %7264 = vmatprep.subr.bf16.mxu0 %v9165_v24 }
 0x694   :  { %7122 = vmatpush3.bf16.msra.mxu1 %v8569_v53 }
 0x695   :  { %7123 = vmatprep.subr.bf16.mxu1 %v9165_v24 }
 0x696   :  { %7266 = vmatpush3.bf16.msra.mxu0 %v8569_v53  ;;  %v7190_v53 = vpack.c.bf16 %v3544_v62, %v3537_v55  ;;  %v7506_v55 = vld [vmem:[%s9098_s17 + $0x68] sm:$0xff]  }
 0x697   :  { %7267 = vmatprep.subr.bf16.mxu0 %v9165_v24  ;;  %v7507_v62 = vld [vmem:[%s9098_s17 + $0xa8] sm:$0xff]  }
 0x698   :  { %7125 = vmatpush3.bf16.msra.mxu1 %v8597_v29 }
 0x699   :  { %7126 = vmatprep.subr.bf16.mxu1 %v9165_v24 }
 0x69a   :  { %7269 = vmatpush3.bf16.msra.mxu0 %v8597_v29  ;;  %v9166_v29 = vand.u32 4294901760, %v8545_v26  ;;  %v9169_v26 = vand.u32 4294901760, %v8565_v48  ;;  %v9173_v48 = vand.u32 4294901760, %v8595_v20  ;;  %v9177_v20 = vand.u32 4294901760, %v8626_v6  ;;  %v7500_v6 = vld [vmem:[%s9098_s17 + $0x58] sm:$0xff]  }
 0x69b   :  { %7270 = vmatprep.subr.bf16.mxu0 %v9165_v24 }
 0x69c   :  { %7128 = vmatpush3.bf16.msra.mxu1 %v8601_v46 }
 0x69d   :  { %7129 = vmatprep.subr.bf16.mxu1 %v9165_v24 }
 0x69e   :  { %7272 = vmatpush3.bf16.msra.mxu0 %v8601_v46  ;;  %v7142_v46 = vpack.c.bf16 %v8718_v30, %v8713_v4  ;;  %v9168_v4 = vand.u32 4294901760, %v8562_v58  ;;  %v9170_v30 = vand.u32 4294901760, %v8575_v13  ;;  %v9172_v58 = vand.u32 4294901760, %v8592_v28 }
 0x69f   :  { %7273 = vmatprep.subr.bf16.mxu0 %v9165_v24  ;;  %v9174_v13 = vand.u32 4294901760, %v8610_v11  ;;  %v9176_v28 = vand.u32 4294901760, %v8623_v59  ;;  %v9178_v11 = vand.u32 4294901760, %v8640_v5  ;;  %v7499_v59 = vld [vmem:[%s9098_s17 + $0x10] sm:$0xff]   ;;  %v7501_v5 = vld [vmem:[%s9098_s17 + $0x98] sm:$0xff]  }
 0x6a0   :  { %7131 = vmatpush3.bf16.msra.mxu1 %v8617_v14 }
 0x6a1   :  { %7132 = vmatprep.subr.bf16.mxu1 %v9165_v24 }
 0x6a2   :  { %7275 = vmatpush3.bf16.msra.mxu0 %v8617_v14 }
 0x6a3   :  { %7276 = vmatprep.subr.bf16.mxu0 %v9165_v24 }
 0x6a4   :  { %7134 = vmatpush3.bf16.msra.mxu1 %v8645_v45 }
 0x6a5   :  { %7135 = vmatprep.subr.bf16.mxu1 %v9165_v24 }
 0x6a6   :  { %7278 = vmatpush3.bf16.msra.mxu0 %v8645_v45  ;;  %v9171_v45 = vand.u32 4294901760, %v8578_v17  ;;  %v9175_v17 = vand.u32 4294901760, %v8613_v21  ;;  %v9179_v21 = vand.u32 4294901760, %v8643_v47  ;;  %v7502_v47 = vld [vmem:[%s9098_s17 + $0x18] sm:$0xff]  }
 0x6a7   :  { %7279 = vmatprep.subr.bf16.mxu0 %v9165_v24 }
 0x6a8   :  { %7137 = vmatpush3.bf16.msra.mxu1 %v8649_v9 }
 0x6a9   :  { %7138 = vmatprep.subr.bf16.mxu1 %v9165_v24 }
 0x6aa   :  { %7281 = vmatpush3.bf16.msra.mxu0 %v8649_v9  ;;  %v9167_v9 = vand.u32 4294901760, %v8547_v23  ;;  %v7196_v23 = vpack.c.bf16 %v9169_v26, %v9168_v4 }
 0x6ab   :  { %7282 = vmatprep.subr.bf16.mxu0 %v9165_v24 }
 0x6ac   :  { %7140 = vmatpush3.bf16.msra.mxu1 %v8657_v38  ;;  %v7193_v14 = vpack.c.bf16 %v9167_v9, %v9166_v29 }
 0x6ad   :  { %7141 = vmatprep.subr.bf16.mxu1 %v9165_v24 }
 0x6ae   :  { %7284 = vmatpush3.bf16.msra.mxu0 %v8657_v38  ;;  %v7199_v38 = vpack.c.bf16 %v9171_v45, %v9170_v30  ;;  %v9180_v30 = vld [vmem:[#allocation12_spill] sm:$0xff] }
 0x6af   :  { %6433 = vmatmul.mubr.f32.vlgmr.msra.gmra.mrb[8].mxu1 %v8729_v49  ;;  %7285 = vmatprep.subr.bf16.mxu0 %v9165_v24 }
 0x6b0   :  { %7143 = vmatpush3.bf16.msra.mxu1 %v7142_v46  ;;  %6467 = vmatprep.mubr.msk.f32.mxu1 %vm7587_vm4, %v9164_v41 }
 0x6b1   :  { %6643 = vmatmul.mubr.f32.vlgmr.msra.gmra.mrb[12].mxu0 %v8735_v61  ;;  %7144 = vmatprep.subr.bf16.mxu1 %v9165_v24 }
 0x6b2   :  { %7287 = vmatpush3.bf16.msra.mxu0 %v7142_v46  ;;  %6677 = vmatprep.mubr.msk.f32.mxu0 %vm7587_vm4, %v9164_v41 }
 0x6b3   :  { %7288 = vmatprep.subr.bf16.mxu0 %v9165_v24 }
 0x6b4   :  { %7146 = vmatpush3.bf16.msra.mxu1 %v8661_v19 }
 0x6b5   :  { %7147 = vmatprep.subr.bf16.mxu1 %v9165_v24 }
 0x6b6   :  { %7290 = vmatpush3.bf16.msra.mxu0 %v8661_v19  ;;  %v7202_v19 = vpack.c.bf16 %v9173_v48, %v9172_v58 }
 0x6b7   :  { %7291 = vmatprep.subr.bf16.mxu0 %v9165_v24 }
 0x6b8   :  { %7149 = vmatpush3.bf16.msra.mxu1 %v8665_v10 }
 0x6b9   :  { %7150 = vmatprep.subr.bf16.mxu1 %v9165_v24 }
 0x6ba   :  { %7293 = vmatpush3.bf16.msra.mxu0 %v8665_v10  ;;  %v7205_v10 = vpack.c.bf16 %v9175_v17, %v9174_v13  ;;  %v9182_v13 = vld [vmem:[#allocation13_spill] sm:$0xff] }
 0x6bb   :  { %7294 = vmatprep.subr.bf16.mxu0 %v9165_v24 }
 0x6bc   :  { %7152 = vmatpush3.bf16.msra.mxu1 %v8669_v34 }
 0x6bd   :  { %7153 = vmatprep.subr.bf16.mxu1 %v9165_v24 }
 0x6be   :  { %7296 = vmatpush3.bf16.msra.mxu0 %v8669_v34  ;;  %v7208_v34 = vpack.c.bf16 %v9177_v20, %v9176_v28 }
 0x6bf   :  { %7297 = vmatprep.subr.bf16.mxu0 %v9165_v24 }
 0x6c0   :  { %7155 = vmatpush3.bf16.msra.mxu1 %v8673_v37 }
 0x6c1   :  { %7156 = vmatprep.subr.bf16.mxu1 %v9165_v24 }
 0x6c2   :  { %7299 = vmatpush3.bf16.msra.mxu0 %v8673_v37  ;;  %v7211_v37 = vpack.c.bf16 %v9179_v21, %v9178_v11 }
 0x6c3   :  { %7300 = vmatprep.subr.bf16.mxu0 %v9165_v24 }
 0x6c4   :  { %7158 = vmatpush3.bf16.msra.mxu1 %v8677_v63 }
 0x6c5   :  { %7159 = vmatprep.subr.bf16.mxu1 %v9165_v24 }
 0x6c6   :  { %7302 = vmatpush3.bf16.msra.mxu0 %v8677_v63  ;;  %v7503_v63 = vld [vmem:[%s9098_s17 + $0x60] sm:$0xff]  }
 0x6c7   :  { %7303 = vmatprep.subr.bf16.mxu0 %v9165_v24 }
 0x6c8   :  { %7161 = vmatpush3.bf16.msra.mxu1 %v8681_v57 }
 0x6c9   :  { %7162 = vmatprep.subr.bf16.mxu1 %v9165_v24 }
 0x6ca   :  { %7305 = vmatpush3.bf16.msra.mxu0 %v8681_v57  ;;  %v7504_v57 = vld [vmem:[%s9098_s17 + $0xa0] sm:$0xff]  }
 0x6cb   :  { %7306 = vmatprep.subr.bf16.mxu0 %v9165_v24 }
 0x6cc   :  { %7164 = vmatpush3.bf16.msra.mxu1 %v8685_v52 }
 0x6cd   :  { %7165 = vmatprep.subr.bf16.mxu1 %v9165_v24 }
 0x6ce   :  { %7308 = vmatpush3.bf16.msra.mxu0 %v8685_v52  ;;  %v7505_v52 = vld [vmem:[%s9098_s17 + $0x20] sm:$0xff]  }
 0x6cf   :  { %6468 = vmatmul.mubr.f32.vlgmr.msra.gmra.mrb[8].mxu1 %v8733_v54  ;;  %7309 = vmatprep.subr.bf16.mxu0 %v9165_v24 }
 0x6d0   :  { %7167 = vmatpush3.bf16.msra.mxu1 %v8370_v1  ;;  %6502 = vmatprep.mubr.msk.f32.mxu1 %vm7587_vm4, %v9164_v41 }
 0x6d1   :  { %6678 = vmatmul.mubr.f32.vlgmr.msra.gmra.mrb[12].mxu0 %v8739_v12  ;;  %7168 = vmatprep.subr.bf16.mxu1 %v9165_v24 }
 0x6d2   :  { %7311 = vmatpush3.bf16.msra.mxu0 %v8370_v1  ;;  %6712 = vmatprep.mubr.msk.f32.mxu0 %vm7587_vm4, %v9164_v41 }
 0x6d3   :  { %7312 = vmatprep.subr.bf16.mxu0 %v9165_v24 }
 0x6d4   :  { %7170 = vmatpush3.bf16.msra.mxu1 %v8435_v60 }
 0x6d5   :  { %7171 = vmatprep.subr.bf16.mxu1 %v9165_v24 }
 0x6d6   :  { %7314 = vmatpush3.bf16.msra.mxu0 %v8435_v60 }
 0x6d7   :  { %7315 = vmatprep.subr.bf16.mxu0 %v9165_v24 }
 0x6d8   :  { %7173 = vmatpush3.bf16.msra.mxu1 %v8453_v18 }
 0x6d9   :  { %7174 = vmatprep.subr.bf16.mxu1 %v9165_v24 }
 0x6da   :  { %7317 = vmatpush3.bf16.msra.mxu0 %v8453_v18 }
 0x6db   :  { %7318 = vmatprep.subr.bf16.mxu0 %v9165_v24 }
 0x6dc   :  { %7176 = vmatpush3.bf16.msra.mxu1 %v8471_v33 }
 0x6dd   :  { %7177 = vmatprep.subr.bf16.mxu1 %v9165_v24 }
 0x6de   :  { %7320 = vmatpush3.bf16.msra.mxu0 %v8471_v33 }
 0x6df   :  { %7321 = vmatprep.subr.bf16.mxu0 %v9165_v24 }
 0x6e0   :  { %7179 = vmatpush3.bf16.msra.mxu1 %v8489_v22 }
 0x6e1   :  { %7180 = vmatprep.subr.bf16.mxu1 %v9165_v24 }
 0x6e2   :  { %7323 = vmatpush3.bf16.msra.mxu0 %v8489_v22 }
 0x6e3   :  { %7324 = vmatprep.subr.bf16.mxu0 %v9165_v24 }
 0x6e4   :  { %7182 = vmatpush3.bf16.msra.mxu1 %v8507_v3 }
 0x6e5   :  { %7183 = vmatprep.subr.bf16.mxu1 %v9165_v24 }
 0x6e6   :  { %7326 = vmatpush3.bf16.msra.mxu0 %v8507_v3 }
 0x6e7   :  { %7327 = vmatprep.subr.bf16.mxu0 %v9165_v24 }
 0x6e8   :  { %7185 = vmatpush3.bf16.msra.mxu1 %v8535_v8 }
 0x6e9   :  { %7186 = vmatprep.subr.bf16.mxu1 %v9165_v24 }
 0x6ea   :  { %7329 = vmatpush3.bf16.msra.mxu0 %v8535_v8 }
 0x6eb   :  { %7330 = vmatprep.subr.bf16.mxu0 %v9165_v24 }
 0x6ec   :  { %7188 = vmatpush3.bf16.msra.mxu1 %v8541_v44 }
 0x6ed   :  { %7189 = vmatprep.subr.bf16.mxu1 %v9165_v24 }
 0x6ee   :  { %7332 = vmatpush3.bf16.msra.mxu0 %v8541_v44 }
 0x6ef   :  { %6503 = vmatmul.mubr.f32.vlgmr.msra.gmra.mrb[8].mxu1 %v3526_v31  ;;  %7333 = vmatprep.subr.bf16.mxu0 %v9165_v24 }
 0x6f0   :  { %7191 = vmatpush3.bf16.msra.mxu1 %v7190_v53  ;;  %6537 = vmatprep.mubr.msk.f32.mxu1 %vm7587_vm4, %v9164_v41 }
 0x6f1   :  { %6713 = vmatmul.mubr.f32.vlgmr.msra.gmra.mrb[12].mxu0 %v4171_v16  ;;  %7192 = vmatprep.subr.bf16.mxu1 %v9165_v24  ;;  %v5307_v16 = vld [vmem:[%s9099_s15] ss:$0 sm:$0xff] }
 0x6f2   :  { %7335 = vmatpush3.bf16.msra.mxu0 %v7190_v53  ;;  %6747 = vmatprep.mubr.msk.f32.mxu0 %vm7587_vm4, %v9164_v41 }
 0x6f3   :  { %7336 = vmatprep.subr.bf16.mxu0 %v9165_v24 }
 0x6f4   :  { %7194 = vmatpush3.bf16.msra.mxu1 %v7193_v14 }
 0x6f5   :  { %7195 = vmatprep.subr.bf16.mxu1 %v9165_v24 }
 0x6f6   :  { %7338 = vmatpush3.bf16.msra.mxu0 %v7193_v14 }
 0x6f7   :  { %7339 = vmatprep.subr.bf16.mxu0 %v9165_v24 }
 0x6f8   :  { %7197 = vmatpush3.bf16.msra.mxu1 %v7196_v23 }
 0x6f9   :  { %7198 = vmatprep.subr.bf16.mxu1 %v9165_v24 }
 0x6fa   :  { %7341 = vmatpush3.bf16.msra.mxu0 %v7196_v23 }
 0x6fb   :  { %7342 = vmatprep.subr.bf16.mxu0 %v9165_v24 }
 0x6fc   :  { %7200 = vmatpush3.bf16.msra.mxu1 %v7199_v38 }
 0x6fd   :  { %7201 = vmatprep.subr.bf16.mxu1 %v9165_v24 }
 0x6fe   :  { %7344 = vmatpush3.bf16.msra.mxu0 %v7199_v38  ;;  %v9181_v38 = vld [vmem:[#allocation14_spill] sm:$0xff] }
 0x6ff   :  { %7345 = vmatprep.subr.bf16.mxu0 %v9165_v24 }
 0x700   :  { %7203 = vmatpush3.bf16.msra.mxu1 %v7202_v19 }
 0x701   :  { %7204 = vmatprep.subr.bf16.mxu1 %v9165_v24 }
 0x702   :  { %7347 = vmatpush3.bf16.msra.mxu0 %v7202_v19 }
 0x703   :  { %7348 = vmatprep.subr.bf16.mxu0 %v9165_v24 }
 0x704   :  { %7206 = vmatpush3.bf16.msra.mxu1 %v7205_v10 }
 0x705   :  { %7207 = vmatprep.subr.bf16.mxu1 %v9165_v24 }
 0x706   :  { %7350 = vmatpush3.bf16.msra.mxu0 %v7205_v10 }
 0x707   :  { %7351 = vmatprep.subr.bf16.mxu0 %v9165_v24 }
 0x708   :  { %7209 = vmatpush3.bf16.msra.mxu1 %v7208_v34 }
 0x709   :  { %7210 = vmatprep.subr.bf16.mxu1 %v9165_v24 }
 0x70a   :  { %7353 = vmatpush3.bf16.msra.mxu0 %v7208_v34  ;;  %v9183_v34 = vld [vmem:[#allocation11_spill] sm:$0xff] }
 0x70b   :  { %7354 = vmatprep.subr.bf16.mxu0 %v9165_v24 }
 0x70c   :  { %7212 = vmatpush3.bf16.msra.mxu1 %v7211_v37 }
 0x70d   :  { %7213 = vmatprep.subr.bf16.mxu1 %v9165_v24 }
 0x70e   :  { %7356 = vmatpush3.bf16.msra.mxu0 %v7211_v37 }
 0x70f   :  { %6538 = vmatmul.mubr.f32.vlgmr.msra.gmra.mrb[8].mxu1 %v8729_v49  ;;  %7357 = vmatprep.subr.bf16.mxu0 %v9165_v24 }
 0x710   :  { %7215 = vmatpush3.bf16.msra.mxu1 %v8370_v1  ;;  %6572 = vmatprep.mubr.msk.f32.mxu1 %vm7587_vm4, %v9164_v41 }
 0x711   :  { %6748 = vmatmul.mubr.f32.vlgmr.msra.gmra.mrb[12].mxu0 %v8735_v61  ;;  %7216 = vmatprep.subr.bf16.mxu1 %v9165_v24 }
 0x712   :  { %7359 = vmatpush3.bf16.msra.mxu0 %v8370_v1  ;;  %6782 = vmatprep.mubr.msk.f32.mxu0 %vm7587_vm4, %v9164_v41  ;;  %v7491_v1 = vld [vmem:[%s9098_s17 + $0x40] sm:$0xff]  }
 0x713   :  { %7360 = vmatprep.subr.bf16.mxu0 %v9165_v24 }
 0x714   :  { %7218 = vmatpush3.bf16.msra.mxu1 %v8435_v60 }
 0x715   :  { %7219 = vmatprep.subr.bf16.mxu1 %v9165_v24 }
 0x716   :  { %7362 = vmatpush3.bf16.msra.mxu0 %v8435_v60  ;;  %v7492_v60 = vld [vmem:[%s9098_s17 + $0x80] sm:$0xff]  }
 0x717   :  { %7363 = vmatprep.subr.bf16.mxu0 %v9165_v24 }
 0x718   :  { %7221 = vmatpush3.bf16.msra.mxu1 %v8453_v18 }
 0x719   :  { %7222 = vmatprep.subr.bf16.mxu1 %v9165_v24 }
 0x71a   :  { %7365 = vmatpush3.bf16.msra.mxu0 %v8453_v18  ;;  %v7493_v18 = vld [vmem:[%s9098_s17] sm:$0xff]  }
 0x71b   :  { %7366 = vmatprep.subr.bf16.mxu0 %v9165_v24 }
 0x71c   :  { %7224 = vmatpush3.bf16.msra.mxu1 %v8471_v33 }
 0x71d   :  { %7225 = vmatprep.subr.bf16.mxu1 %v9165_v24 }
 0x71e   :  { %7368 = vmatpush3.bf16.msra.mxu0 %v8471_v33  ;;  %v7494_v33 = vld [vmem:[%s9098_s17 + $0x48] sm:$0xff]  }
 0x71f   :  { %7369 = vmatprep.subr.bf16.mxu0 %v9165_v24 }
 0x720   :  { %7227 = vmatpush3.bf16.msra.mxu1 %v8489_v22 }
 0x721   :  { %7228 = vmatprep.subr.bf16.mxu1 %v9165_v24 }
 0x722   :  { %7371 = vmatpush3.bf16.msra.mxu0 %v8489_v22  ;;  %v7495_v22 = vld [vmem:[%s9098_s17 + $0x88] sm:$0xff]  }
 0x723   :  { %7372 = vmatprep.subr.bf16.mxu0 %v9165_v24 }
 0x724   :  { %7230 = vmatpush3.bf16.msra.mxu1 %v8507_v3 }
 0x725   :  { %7231 = vmatprep.subr.bf16.mxu1 %v9165_v24 }
 0x726   :  { %7374 = vmatpush3.bf16.msra.mxu0 %v8507_v3  ;;  %v7496_v3 = vld [vmem:[%s9098_s17 + $0x8] sm:$0xff]  }
 0x727   :  { %7375 = vmatprep.subr.bf16.mxu0 %v9165_v24 }
 0x728   :  { %7233 = vmatpush3.bf16.msra.mxu1 %v8535_v8 }
 0x729   :  { %7234 = vmatprep.subr.bf16.mxu1 %v9165_v24 }
 0x72a   :  { %7377 = vmatpush3.bf16.msra.mxu0 %v8535_v8  ;;  %v7497_v8 = vld [vmem:[%s9098_s17 + $0x50] sm:$0xff]  }
 0x72b   :  { %7378 = vmatprep.subr.bf16.mxu0 %v9165_v24 }
 0x72c   :  { %7236 = vmatpush3.bf16.msra.mxu1 %v8541_v44 }
 0x72d   :  { %5793 = vmatprep.subr.bf16.mxu1 %v7491_v1 }
 0x72e   :  { %7380 = vmatpush3.bf16.msra.mxu0 %v8541_v44  ;;  %v7498_v44 = vld [vmem:[%s9098_s17 + $0x90] sm:$0xff]  }
 0x72f   :  { %6573 = vmatmul.mubr.f32.vlgmr.msra.gmra.mrb[8].mxu1 %v8729_v49  ;;  %6785 = vmatprep.subr.bf16.mxu0 %v7492_v60  ;;  %v7514_v49 = vld [vmem:[%s9098_s17 + $0x38] sm:$0xff]  }
 0x730   :  { %5794 = vmatpush3.bf16.msra.mxu1 %v7493_v18 }
 0x731   :  { %6783 = vmatmul.mubr.f32.vlgmr.msra.gmra.mrb[12].mxu0 %v8735_v61  ;;  %5795 = vmatprep.subr.bf16.mxu1 %v7494_v33 }
 0x732   :  { %6786 = vmatpush3.bf16.msra.mxu0 %v7492_v60 }
 0x733   :  { %6787 = vmatprep.subr.bf16.mxu0 %v7495_v22 }
 0x734   :  { %5796 = vmatpush3.bf16.msra.mxu1 %v7496_v3 }
 0x735   :  { %5797 = vmatprep.subr.bf16.mxu1 %v7497_v8 }
 0x736   :  { %6788 = vmatpush3.bf16.msra.mxu0 %v7495_v22 }
 0x737   :  { %6789 = vmatprep.subr.bf16.mxu0 %v7498_v44 }
 0x738   :  { %5798 = vmatpush3.bf16.msra.mxu1 %v7499_v59 }
 0x739   :  { %5799 = vmatprep.subr.bf16.mxu1 %v7500_v6 }
 0x73a   :  { %6790 = vmatpush3.bf16.msra.mxu0 %v7498_v44 }
 0x73b   :  { %6791 = vmatprep.subr.bf16.mxu0 %v7501_v5 }
 0x73c   :  { %5800 = vmatpush3.bf16.msra.mxu1 %v7502_v47 }
 0x73d   :  { %5801 = vmatprep.subr.bf16.mxu1 %v7503_v63 }
 0x73e   :  { %6792 = vmatpush3.bf16.msra.mxu0 %v7501_v5 }
 0x73f   :  { %6793 = vmatprep.subr.bf16.mxu0 %v7504_v57 }
 0x740   :  { %5802 = vmatpush3.bf16.msra.mxu1 %v7505_v52 }
 0x741   :  { %5803 = vmatprep.subr.bf16.mxu1 %v7506_v55 }
 0x742   :  { %6794 = vmatpush3.bf16.msra.mxu0 %v7504_v57 }
 0x743   :  { %6795 = vmatprep.subr.bf16.mxu0 %v7507_v62 }
 0x744   :  { %5804 = vmatpush3.bf16.msra.mxu1 %v7508_v42 }
 0x745   :  { %5805 = vmatprep.subr.bf16.mxu1 %v7509_v43 }
 0x746   :  { %6796 = vmatpush3.bf16.msra.mxu0 %v7507_v62 }
 0x747   :  { %6797 = vmatprep.subr.bf16.mxu0 %v7510_v35 }
 0x748   :  { %5806 = vmatpush3.bf16.msra.mxu1 %v7511_v56 }
 0x749   :  { %5807 = vmatprep.subr.bf16.mxu1 %v7512_v39 }
 0x74a   :  { %6798 = vmatpush3.bf16.msra.mxu0 %v7510_v35 }
 0x74b   :  { %6799 = vmatprep.subr.bf16.mxu0 %v7513_v40 }
 0x74c   :  { %5808 = vmatpush3.bf16.msra.mxu1 %v7514_v49 }
 0x74e   :  { %6800 = vmatpush3.bf16.msra.mxu0 %v7513_v40 }
 0x802   :  { %v4080_v50 = vpop.f32.mrb[8].mxu1 }
 0x803   :  { %v4729_v54 = vmul.f32 %v4080_v50, %v4080_v50  ;;  %v6574_v61 = vpop.f32.mrb[9].mxu1 }
 0x804   :  { %v4725_v36 = vpop.f32.mrb[12].mxu0 }
 0x805   :  { %v4730_v0 = vsub.f32 %v4725_v36, %v4729_v54  ;;  %v6784_v31 = vpop.f32.mrb[13].mxu0 }
 0x807   :  { %v4731_v12 = vmax.f32 %v4730_v0, 0.0 }
 0x809   :  { %v4732_v7 = vadd.f32 1e-05, %v4731_v12 }
 0x80b   :  { %7551 = vrsqrt.f32 %v4732_v7 }
 0x815   :  { %v7552_v51 = vpop.eup %7551 }
 0x816   :  { %v4740_v25 = vmul.f32 %v7552_v51, %v5307_v16 }
 0x818   :  { %v4741_v2 = vmul.f32 %v4740_v25, %v4080_v50  ;;  %v4756_v41 = vrot.slane %v4740_v25, %v8065_v27 }
 0x81a   :  { %v4748_v24 = vsub.f32 %v5308_v15, %v4741_v2  ;;  %v4757_v46 = vcombine.high %v4756_v41, %v4756_v41  ;;  %v4764_v53 = vrot.slane %v4756_v41, %v8065_v27 }
 0x81c   :  { %v4771_v29 = vrot.slane %v4757_v46, %v8065_v27  ;;  %v4775_v9 = vrot.slane %v4764_v53, %v8071_v32  ;;  %v4793_v14 = vrot.slane %v4748_v24, %v8065_v27 }
 0x81e   :  { %v4779_v4 = vrot.slane %v4771_v29, %v8071_v32  ;;  %v4794_v26 = vcombine.high %v4793_v14, %v4793_v14  ;;  %v4801_v23 = vrot.slane %v4793_v14, %v8065_v27  ;;  %v4782_v45 = vmul.f32 %v4775_v9, %v9180_v30 }
 0x81f   :  { %v4783_v58 = vmul.f32 %v4775_v9, %v9181_v38 }
 0x820   :  { %v4808_v48 = vrot.slane %v4794_v26, %v8065_v27  ;;  %v4812_v19 = vrot.slane %v4801_v23, %v8071_v32  ;;  %v4785_v17 = vmul.f32 %v4779_v4, %v9182_v13  ;;  %v4784_v11 = vmul.f32 %v4779_v4, %v9183_v34  ;;  %v9186_v13 = vld [vmem:[#allocation8_spill] sm:$0xff] }
 0x822   :  { %v4816_v10 = vrot.slane %v4808_v48, %v8071_v32  ;;  %v4819_v28 = vadd.f32 %v4812_v19, %v4782_v45  ;;  %v4820_v20 = vadd.f32 %v4812_v19, %v4783_v58  ;;  %v9185_v48 = vld [vmem:[#allocation6_spill] sm:$0xff] }
 0x824   :  { %v4822_v21 = vadd.f32 %v4816_v10, %v4785_v17  ;;  %v4823_v37 = vmin.f32 %v4819_v28, 30.0  ;;  %v4824_v1 = vmin.f32 %v4820_v20, 30.0  ;;  %v4821_v60 = vadd.f32 %v4816_v10, %v4784_v11 }
 0x826   :  { %v4826_v18 = vmin.f32 %v4822_v21, 30.0  ;;  %v4827_v33 = vmul.f32 1.442695, %v4823_v37  ;;  %v4829_v22 = vmul.f32 1.442695, %v4824_v1  ;;  %v4825_v3 = vmin.f32 %v4821_v60, 30.0 }
 0x827   :  { %v9189_v1 = vld [vmem:[#allocation7_spill] sm:$0xff] }
 0x828   :  { %7553 = vpow2.f32 %v4827_v33  ;;  %v4833_v27 = vmul.f32 1.442695, %v4826_v18  ;;  %v4831_v8 = vmul.f32 1.442695, %v4825_v3  ;;  %v9190_v18 = vld [vmem:[#allocation10_spill] sm:$0xff] }
 0x829   :  { %7555 = vpow2.f32 %v4829_v22 }
 0x82a   :  { %7557 = vpow2.f32 %v4833_v27 }
 0x82b   :  { %7559 = vpow2.f32 %v4831_v8  ;;  %v9191_v8 = vld [vmem:[#allocation3_spill] sm:$0xff] }
 0x832   :  { %v7554_v44 = vpop.eup %7553 }
 0x833   :  { %v7556_v32 = vpop.eup %7555  ;;  %v4835_v59 = vadd.f32 2.0, %v7554_v44 }
 0x834   :  { %v7558_v6 = vpop.eup %7557  ;;  %v4836_v5 = vadd.f32 2.0, %v7556_v32 }
 0x835   :  { %v7560_v47 = vpop.eup %7559  ;;  %v4838_v63 = vadd.f32 2.0, %v7558_v6  ;;  %v4839_v57 = vmul.f32 %v7554_v44, %v4835_v59 }
 0x836   :  { %v4840_v52 = vmul.f32 %v7556_v32, %v4836_v5  ;;  %v4837_v55 = vadd.f32 2.0, %v7560_v47  ;;  %v9192_v32 = vld [vmem:[#allocation5_spill] sm:$0xff] }
 0x837   :  { %v4842_v62 = vmul.f32 %v7558_v6, %v4838_v63  ;;  %v4843_v42 = vadd.f32 2.0, %v4839_v57 }
 0x838   :  { %v4844_v43 = vadd.f32 2.0, %v4840_v52  ;;  %v4841_v35 = vmul.f32 %v7560_v47, %v4837_v55 }
 0x839   :  { %v4846_v56 = vadd.f32 2.0, %v4842_v62  ;;  %7561 = vrcp.f32 %v4843_v42  ;;  %v5309_v62 = vld [vmem:[%s9101_s18] ss:$0 sm:$0xff] }
 0x83a   :  { %7563 = vrcp.f32 %v4844_v43  ;;  %v4845_v39 = vadd.f32 2.0, %v4841_v35 }
 0x83b   :  { %7565 = vrcp.f32 %v4846_v56 }
 0x83c   :  { %7567 = vrcp.f32 %v4845_v39 }
 0x843   :  { %v7562_v40 = vpop.eup %7561 }
 0x844   :  { %v7564_v49 = vpop.eup %7563  ;;  %v4851_v50 = vmul.f32 2.0, %v7562_v40 }
 0x845   :  { %v7566_v54 = vpop.eup %7565  ;;  %v4852_v61 = vmul.f32 2.0, %v7564_v49 }
 0x846   :  { %v7568_v36 = vpop.eup %7567  ;;  %v4854_v0 = vmul.f32 2.0, %v7566_v54  ;;  %v4855_v31 = vsub.f32 1.0, %v4851_v50 }
 0x847   :  { %v4856_v12 = vsub.f32 1.0, %v4852_v61  ;;  %v4853_v7 = vmul.f32 2.0, %v7568_v36 }
 0x848   :  { %v4858_v16 = vsub.f32 1.0, %v4854_v0  ;;  %v4859_v51 = vmul.f32 %v4855_v31, %v4819_v28  ;;  %v9187_v28 = vld [vmem:[#allocation4_spill] sm:$0xff] }
 0x849   :  { %v4860_v25 = vmul.f32 %v4856_v12, %v4820_v20  ;;  %v4857_v15 = vsub.f32 1.0, %v4853_v7 }
 0x84a   :  { %v4862_v2 = vmul.f32 %v4858_v16, %v4822_v21  ;;  %v4865_v41 = vrot.slane %v4859_v51, 7  ;;  %v4879_v24 = vrot.slane %v4859_v51, 1  ;;  %v9188_v21 = vld [vmem:[#allocation9_spill] sm:$0xff] }
 0x84b   :  { %v4866_v46 = vrot.slane %v4860_v25, 7  ;;  %v4861_v53 = vmul.f32 %v4857_v15, %v4821_v60  ;;  %v4880_v29 = vrot.slane %v4860_v25, 1  ;;  %v4863_v9 = vpack.c.bf16 %v4860_v25, %v4859_v51 }
 0x84c   :  { %v4868_v14 = vrot.slane %v4862_v2, 7  ;;  %v4882_v4 = vrot.slane %v4862_v2, 1 }
 0x84d   :  { %v4871_v23 = vsel %vm105_vm2, %v4865_v41, %v4866_v46  ;;  %v4881_v30 = vrot.slane %v4861_v53, 1  ;;  %v4885_v45 = vsel %vm263_vm3, %v4879_v24, %v4880_v29  ;;  %v4867_v38 = vrot.slane %v4861_v53, 7 }
 0x84e   :  { %v4872_v58 = vsel %vm105_vm2, %v4868_v14, %v4865_v41  ;;  %v4874_v19 = vmul.f32 %v4871_v23, %v9185_v48  ;;  %v4887_v17 = vmul.f32 %v4885_v45, %v9186_v13  ;;  %v4886_v10 = vsel %vm263_vm3, %v4882_v4, %v4879_v24 }
 0x84f   :  { %v4873_v20 = vmul.f32 %v4872_v58, %v9187_v28  ;;  %v4884_v34 = vsel %vm263_vm3, %v4880_v29, %v4881_v30  ;;  %v4883_v11 = vsel %vm263_vm3, %v4881_v30, %v4882_v4  ;;  %v4890_v37 = vmul.f32 %v4886_v10, %v9188_v21 }
 0x850   :  { %v4888_v60 = vmul.f32 %v4884_v34, %v9189_v1  ;;  %v4889_v33 = vmul.f32 %v4883_v11, %v9190_v18  ;;  %v4869_v22 = vsel %vm105_vm2, %v4867_v38, %v4868_v14  ;;  %v4870_v3 = vsel %vm105_vm2, %v4866_v46, %v4867_v38 }
 0x851   :  { %v4877_v27 = vpack.c.bf16 %v4874_v19, %v4873_v20  ;;  %v4875_v44 = vmul.f32 %v4870_v3, %v9191_v8  ;;  %v4876_v59 = vmul.f32 %v4869_v22, %v9192_v32  ;;  %v4864_v6 = vpack.c.bf16 %v4862_v2, %v4861_v53 }
 0x852   :  { %v4891_v5 = vpack.c.bf16 %v4888_v60, %v4887_v17  ;;  %v4892_v47 = vpack.c.bf16 %v4890_v37, %v4889_v33 }
 0x853   :  { %5124 = vmatprep.mubr.bf16.mxu1 %v4877_v27  ;;  %v4878_v63 = vpack.c.bf16 %v4876_v59, %v4875_v44 }
 0x854   :  { %6801 = vmatprep.mubr.bf16.mxu0 %v4891_v5  ;;  %5125 = vmatmul.mubr.bf16.vlgmr.msra.gmra.mrb[12].mxu1 %v4863_v9 }
 0x855   :  { %6802 = vmatmul.mubr.bf16.vlgmr.msra.gmra.mrb[16].mxu0 %v4892_v47  ;;  %5132 = vmatprep.mubr.bf16.mxu1 %v4878_v63 }
 0x85c   :  { %5133 = vmatmul.mubr.bf16.gmra.mrb[16].mxu1 %v4864_v6 }
 0x927   :  { %v5809_v57 = vpop.f32.mrb[12].mxu1 }
 0x928   :  { %v6803_v52 = vpop.f32.mrb[16].mxu0  ;;  %v5810_v55 = vpop.f32.mrb[13].mxu1 }
 0x929   :  { %v5811_v42 = vadd.f32 %v5810_v55, %v5809_v57  ;;  %v5175_v43 = vpop.f32.mrb[17].mxu0  ;;  %v5812_v35 = vpop.f32.mrb[14].mxu1 }
 0x92a   :  { %v6804_v56 = vpop.f32.mrb[18].mxu0  ;;  %v5813_v39 = vpop.f32.mrb[15].mxu1 }
 0x92b   :  { %v5127_v40 = vadd.f32 %v5811_v42, %v5309_v62  ;;  %v5814_v49 = vadd.f32 %v5813_v39, %v5812_v35  ;;  %v5178_v50 = vpop.f32.mrb[19].mxu0 }
 0x92d   :  { %v5176_v54 = vadd.f32 %v5175_v43, %v5127_v40  ;;  %v5130_v61 = vadd.f32 %v5814_v49, %v5309_v62 }
 0x92f   :  { %v5190_v36 = vmin.f32 %v5176_v54, 30.0  ;;  %v5179_v0 = vadd.f32 %v5178_v50, %v5130_v61  ;;  %v5815_v31 = vpop.f32.mrb[16].mxu1 }
 0x930   :  { %v5816_v12 = vpop.f32.mrb[17].mxu1 }
 0x931   :  { %v5194_v7 = vmul.f32 1.442695, %v5190_v36  ;;  %v5191_v16 = vmin.f32 %v5179_v0, 30.0  ;;  %v5817_v51 = vadd.f32 %v5816_v12, %v5815_v31  ;;  %v5818_v25 = vpop.f32.mrb[18].mxu1 }
 0x932   :  { %v5819_v15 = vpop.f32.mrb[19].mxu1 }
 0x933   :  { %7569 = vpow2.f32 %v5194_v7  ;;  %v5196_v2 = vmul.f32 1.442695, %v5191_v16  ;;  %v5135_v41 = vadd.f32 %v5817_v51, %v5309_v62  ;;  %v5820_v24 = vadd.f32 %v5819_v15, %v5818_v25 }
 0x935   :  { %7571 = vpow2.f32 %v5196_v2  ;;  %v5184_v46 = vadd.f32 %v6803_v52, %v5135_v41  ;;  %v5138_v53 = vadd.f32 %v5820_v24, %v5309_v62 }
 0x937   :  { %v5192_v29 = vmin.f32 %v5184_v46, 30.0  ;;  %v5187_v9 = vadd.f32 %v6804_v56, %v5138_v53 }
 0x939   :  { %v5198_v14 = vmul.f32 1.442695, %v5192_v29  ;;  %v5193_v4 = vmin.f32 %v5187_v9, 30.0 }
 0x93b   :  { %7573 = vpow2.f32 %v5198_v14  ;;  %v5200_v26 = vmul.f32 1.442695, %v5193_v4 }
 0x93d   :  { %v7570_v23 = vpop.eup %7569  ;;  %7575 = vpow2.f32 %v5200_v26 }
 0x93e   :  { %v5202_v30 = vadd.f32 2.0, %v7570_v23 }
 0x93f   :  { %v7572_v45 = vpop.eup %7571 }
 0x940   :  { %v5206_v38 = vmul.f32 %v7570_v23, %v5202_v30  ;;  %v5203_v58 = vadd.f32 2.0, %v7572_v45 }
 0x942   :  { %v5210_v48 = vadd.f32 2.0, %v5206_v38  ;;  %v5207_v19 = vmul.f32 %v7572_v45, %v5203_v58 }
 0x944   :  { %7577 = vrcp.f32 %v5210_v48  ;;  %v5211_v13 = vadd.f32 2.0, %v5207_v19 }
 0x945   :  { %v7574_v17 = vpop.eup %7573 }
 0x946   :  { %7579 = vrcp.f32 %v5211_v13  ;;  %v5204_v10 = vadd.f32 2.0, %v7574_v17 }
 0x947   :  { %v7576_v28 = vpop.eup %7575 }
 0x948   :  { %v5208_v20 = vmul.f32 %v7574_v17, %v5204_v10  ;;  %v5205_v34 = vadd.f32 2.0, %v7576_v28 }
 0x94a   :  { %v5212_v11 = vadd.f32 2.0, %v5208_v20  ;;  %v5209_v21 = vmul.f32 %v7576_v28, %v5205_v34 }
 0x94c   :  { %7581 = vrcp.f32 %v5212_v11  ;;  %v5213_v37 = vadd.f32 2.0, %v5209_v21 }
 0x94e   :  { %v7578_v1 = vpop.eup %7577  ;;  %7583 = vrcp.f32 %v5213_v37 }
 0x94f   :  { %v5218_v60 = vmul.f32 2.0, %v7578_v1 }
 0x950   :  { %v7580_v18 = vpop.eup %7579 }
 0x951   :  { %v5222_v33 = vsub.f32 1.0, %v5218_v60  ;;  %v5219_v22 = vmul.f32 2.0, %v7580_v18 }
 0x953   :  { %v5226_v3 = vmul.f32 %v5222_v33, %v5176_v54  ;;  %v5223_v27 = vsub.f32 1.0, %v5219_v22 }
 0x955   :  { %5230 = vst [vmem:[%s9102_s19] sm:$0xff] %v5226_v3  ;;  %v5227_v8 = vmul.f32 %v5223_v27, %v5179_v0 }
 0x956   :  { %v7582_v44 = vpop.eup %7581 }
 0x957   :  { %5231 = vst [vmem:[%s9102_s19 + $0x8] sm:$0xff] %v5227_v8  ;;  %v5220_v32 = vmul.f32 2.0, %v7582_v44 }
 0x958   :  { %v7584_v59 = vpop.eup %7583 }
 0x959   :  { %v5224_v6 = vsub.f32 1.0, %v5220_v32  ;;  %v5221_v5 = vmul.f32 2.0, %v7584_v59 }
 0x95b   :  { %v5228_v47 = vmul.f32 %v5224_v6, %v5184_v46  ;;  %v5225_v63 = vsub.f32 1.0, %v5221_v5 }
 0x95d   :  { %5232 = vst [vmem:[%s9102_s19 + $0x10] sm:$0xff] %v5228_v47  ;;  %v5229_v57 = vmul.f32 %v5225_v63, %v5187_v9 }
 0x95f   :  { %5233 = vst [vmem:[%s9102_s19 + $0x18] sm:$0xff] %v5229_v57 }

</bundles_post_ra>
